<compile_context>
chip_gen: v7x
topology: tpu7x:2x2x1
jax: 0.10.0
libtpu: 0.0.40
codegen_flags: <defaults>
</compile_context>

<pallas_src>
import functools

import jax
import jax.numpy as jnp
from jax.experimental import pallas as pl
from jax.experimental.pallas import tpu as pltpu


# Scoped-VMEM budget: well under v5e/v6e's 128 MiB and under the ~56-60 MiB
# ceiling recommended for v7x's 64 MiB physical VMEM.
_VMEM_LIMIT = 48 * 1024 * 1024


def _pick_cout_tile(cout: int) -> int:
    # Lane-dense output tiles (>=128 lanes) when emb_dim allows; the fallback
    # only triggers for demo-sized emb_dim (production T2M-GPT uses 512).
    for cand in (256, 128):
        if cout % cand == 0:
            return cand
    return cout


def _pick_t_tile(t: int) -> int:
    # Bound the resblock accumulator to (tt, C) while keeping decent MXU fill.
    for cand in (32, 64, 16, 8):
        if t % cand == 0:
            return cand
    return t


# ----------------------------------------------------------------------------
# Generic Conv1d kernel: in-kernel tap accumulation + bias (+ ReLU).
# Input is already zero-halo'd (carries the conv's padding rows); output is
# optionally written with the NEXT layer's zero-halo rows ("producer pads").
# ----------------------------------------------------------------------------
def _conv_taps_kernel(xg_ref, w_ref, b_ref, o_ref, *, taps, t_out, relu,
                      pad_out):
    tn = o_ref.shape[-1]
    # Hoisted cast: cast the whole (G, s*Cin) tile to bf16 once; the taps
    # reuse overlapping slices of the bf16 copy.
    xb = xg_ref[...].astype(jnp.bfloat16)
    acc = jnp.zeros((t_out, tn), jnp.float32)
    for q in range(taps):                                  # static, unrolled
        acc += jnp.dot(xb[q:q + t_out], w_ref[q],
                       preferred_element_type=jnp.float32)
    acc = acc + b_ref[...]
    if relu:
        acc = jnp.maximum(acc, 0.0)
    acc = acc.astype(o_ref.dtype)
    if pad_out:
        zero_row = jnp.zeros((1, tn), o_ref.dtype)
        o_ref[pl.ds(0, 1), :] = zero_row
        o_ref[pl.ds(t_out + 1, 1), :] = zero_row
        o_ref[pl.ds(1, t_out), :] = acc
    else:
        o_ref[...] = acc


def conv1d_prepadded(x_halo, wg, b2, *, stride, relu, pad_out):
    """Conv1d on a channel-last activation that already carries the conv's
    zero padding rows.

    x_halo: (B, T + 2*pad, Cin)    wg: (taps, s*Cin, Cout) bf16 (prepacked)
    b2:     (1, Cout) f32          out: (B, T_out + 2, Cout) if pad_out
                                        else (B, T_out, Cout)
    """
    B, Tp, Cin = x_halo.shape
    taps, cin_g, Cout = wg.shape
    s = stride
    assert cin_g == s * Cin and Tp % s == 0
    K = taps * s
    t_out = (Tp - K) // s + 1
    G = Tp // s
    # Group stride-s rows so every tap read in the kernel is a contiguous
    # slice.  Row-major contiguous reshape -> free at the XLA level.
    xg = x_halo.reshape(B, G, cin_g)

    tn = _pick_cout_tile(Cout)
    t_dim = t_out + 2 if pad_out else t_out
    # B innermost: the (large) weight tile's block index is constant across
    # consecutive grid steps -> not re-DMA'd per batch element.
    grid = (Cout // tn, B)

    return pl.pallas_call(
        functools.partial(_conv_taps_kernel, taps=taps, t_out=t_out,
                          relu=relu, pad_out=pad_out),
        out_shape=jax.ShapeDtypeStruct((B, t_dim, Cout), x_halo.dtype),
        grid=grid,
        in_specs=[
            pl.BlockSpec((None, G, cin_g), lambda j, bi: (bi, 0, 0)),
            pl.BlockSpec((taps, cin_g, tn), lambda j, bi: (0, 0, j)),
            pl.BlockSpec((1, tn), lambda j, bi: (0, j)),
        ],
        out_specs=pl.BlockSpec((None, t_dim, tn), lambda j, bi: (bi, 0, j)),
        compiler_params=pltpu.CompilerParams(
            dimension_semantics=("parallel", "parallel"),
            vmem_limit_bytes=_VMEM_LIMIT),
    )(xg, wg, b2)


# ----------------------------------------------------------------------------
# Fused Resnet1D block:  h + conv_k1( relu( conv_k3( relu(h) ) ) )
# Single pallas_call, tiled over T; input/output blocks stay resident across
# the T tiles, intermediates never touch HBM.
# ----------------------------------------------------------------------------
def _resblock_kernel(hp_ref, w1_ref, b1_ref, w2_ref, b2_ref, o_ref, *,
                     tt, t_out, pad_out):
    C = o_ref.shape[-1]
    ti = pl.program_id(1)
    base = pl.multiple_of(ti * tt, tt)

    # Hoisted ReLU + bf16 cast of the tile (+ 2-row halo); relu(0) = 0, so the
    # halo rows stay valid zero padding for the k=3 conv.
    hseg = hp_ref[pl.ds(base, tt + 2), :]                     # f32 (tt+2, C)
    hb = jnp.maximum(hseg, 0.0).astype(jnp.bfloat16)

    acc = jnp.zeros((tt, C), jnp.float32)
    for q in range(3):                                        # static, unrolled
        acc += jnp.dot(hb[q:q + tt], w1_ref[q],
                       preferred_element_type=jnp.float32)
    bact = jnp.maximum(acc + b1_ref[...], 0.0)                # second ReLU (f32)
    # conv_k1 + residual, f32 accumulation / add.
    y = jnp.dot(bact.astype(jnp.bfloat16), w2_ref[...],
                preferred_element_type=jnp.float32) + b2_ref[...]
    out_tile = (hseg[1:tt + 1, :] + y).astype(o_ref.dtype)    # unpadded h + y

    if pad_out:
        @pl.when(ti == 0)
        def _():
            zero_row = jnp.zeros((1, C), o_ref.dtype)
            o_ref[pl.ds(0, 1), :] = zero_row
            o_ref[pl.ds(t_out + 1, 1), :] = zero_row
        o_ref[pl.ds(base + 1, tt), :] = out_tile
    else:
        o_ref[pl.ds(base, tt), :] = out_tile


def resnet1d_block(h_halo, w1g, b1, w2m, b2, *, pad_out):
    """h_halo: (B, T+2, C) zero-halo'd.  Returns
    h + conv_k1(relu(conv_k3(relu(h)))) as (B, T+2, C) halo'd (pad_out=True)
    or (B, T, C)."""
    B, Tp, C = h_halo.shape
    T = Tp - 2
    tt = _pick_t_tile(T)
    n_t = T // tt
    t_dim = Tp if pad_out else T

    return pl.pallas_call(
        functools.partial(_resblock_kernel, tt=tt, t_out=T, pad_out=pad_out),
        out_shape=jax.ShapeDtypeStruct((B, t_dim, C), h_halo.dtype),
        grid=(B, n_t),
        in_specs=[
            pl.BlockSpec((None, Tp, C), lambda bi, ti: (bi, 0, 0)),
            pl.BlockSpec((3, C, C), lambda bi, ti: (0, 0, 0)),
            pl.BlockSpec((1, C), lambda bi, ti: (0, 0)),
            pl.BlockSpec((C, C), lambda bi, ti: (0, 0)),
            pl.BlockSpec((1, C), lambda bi, ti: (0, 0)),
        ],
        out_specs=pl.BlockSpec((None, t_dim, C), lambda bi, ti: (bi, 0, 0)),
        compiler_params=pltpu.CompilerParams(
            dimension_semantics=("parallel", "arbitrary"),
            vmem_limit_bytes=_VMEM_LIMIT),
    )(h_halo, w1g, b1, w2m, b2)


# ----------------------------------------------------------------------------
# Parameters: deterministic kaiming-normal weights (zero bias), pre-packed
# ONCE into the kernels' tap layout (bf16) at init time.
# ----------------------------------------------------------------------------
def _kaiming_conv1d(key, c_out, c_in, k):
    fan_in = c_in * k
    std = (2.0 / fan_in) ** 0.5
    return jax.random.normal(key, (c_out, c_in, k), dtype=jnp.float32) * std


def _pack_conv_weight(w, stride):
    """(Cout, Cin, K) PyTorch layout -> (K/stride, stride*Cin, Cout) bf16."""
    c_out, c_in, k = w.shape
    taps = k // stride
    wg = jnp.transpose(w, (2, 1, 0)).reshape(taps, stride * c_in, c_out)
    return wg.astype(jnp.bfloat16)


def init_encoder_params(key, L, in_dim, emb_dim):
    params = {}
    key, sub = jax.random.split(key)
    params["conv1_wg"] = _pack_conv_weight(
        _kaiming_conv1d(sub, emb_dim, in_dim, 3), 1)
    params["conv1_b"] = jnp.zeros((1, emb_dim), jnp.float32)
    params["blocks"] = []
    for _ in range(L):
        key, k1, k2, k3 = jax.random.split(key, 4)
        w_down = _kaiming_conv1d(k1, emb_dim, emb_dim, 4)
        w_res1 = _kaiming_conv1d(k2, emb_dim, emb_dim, 3)
        w_res2 = _kaiming_conv1d(k3, emb_dim, emb_dim, 1)
        params["blocks"].append({
            "down_wg": _pack_conv_weight(w_down, 2),
            "down_b": jnp.zeros((1, emb_dim), jnp.float32),
            "res_w1g": _pack_conv_weight(w_res1, 1),
            "res_b1": jnp.zeros((1, emb_dim), jnp.float32),
            "res_w2m": jnp.transpose(w_res2[:, :, 0], (1, 0)).astype(jnp.bfloat16),
            "res_b2": jnp.zeros((1, emb_dim), jnp.float32),
        })
    return params


# ----------------------------------------------------------------------------
# Encoder forward
# ----------------------------------------------------------------------------
def encoder_forward(x, params):
    """x: (B, T, X) -> (B, emb_dim, T / 2**L)  (matches PyTorch Encoder)."""
    B, T, _ = x.shape
    n_blocks = len(params["blocks"])
    assert T % (2 ** n_blocks) == 0, "T must be divisible by 2**L"

    # The ONLY HBM pad in the network: the raw (small, in_dim-channel) input.
    # Every kernel after this writes its own zero-halo rows, so intermediate
    # activations never take a separate pad pass.
    h = jnp.pad(x, ((0, 0), (1, 1), (0, 0)))

    # conv1 (k=3, s=1, p=1) + fused ReLU; output carries the next conv's halo.
    h = conv1d_prepadded(h, params["conv1_wg"], params["conv1_b"],
                         stride=1, relu=True, pad_out=True)

    for i, blk in enumerate(params["blocks"]):
        last = i == n_blocks - 1
        # downsampling conv (k=4, s=2, p=1), no activation; halo'd output.
        h = conv1d_prepadded(h, blk["down_wg"], blk["down_b"],
                             stride=2, relu=False, pad_out=True)
        # fused Resnet1D block; halo'd output except for the last block.
        h = resnet1d_block(h, blk["res_w1g"], blk["res_b1"],
                           blk["res_w2m"], blk["res_b2"], pad_out=not last)

    # Back to PyTorch Conv1d output layout (B, C, T_out).  This transpose acts
    # on the smallest activation in the network (negligible HBM traffic).
    return jnp.transpose(h, (0, 2, 1))


# ----------------------------------------------------------------------------
# Demo
# ----------------------------------------------------------------------------
if __name__ == "__main__":
    B, T, IN_DIM, EMB_DIM, L = 2, 16, 12, 32, 2

    key = jax.random.PRNGKey(0)
    key, k_x, k_p = jax.random.split(key, 3)
    x = jax.random.normal(k_x, (B, T, IN_DIM), dtype=jnp.float32)
    params = init_encoder_params(k_p, L, IN_DIM, EMB_DIM)

    fwd = jax.jit(lambda xx: encoder_forward(xx, params))
    out = fwd(x)
    jax.block_until_ready(out)

    expected_shape = (B, EMB_DIM, T // (2 ** L))
    assert out.shape == expected_shape, (out.shape, expected_shape)
    assert bool(jnp.all(jnp.isfinite(out)))
    print("KERNEL_OK")
</pallas_src>

<mosaic_0001>
module attributes {stable_mosaic.version = 11 : i64} {
  func.func @_conv_taps_kernel(%arg0: i32, %arg1: i32, %arg2: memref<1x18x12xf32, #tpu.memory_space<vmem>>, %arg3: memref<3x12x32xbf16, #tpu.memory_space<vmem>>, %arg4: memref<1x32xf32, #tpu.memory_space<vmem>>, %arg5: memref<1x18x32xf32, #tpu.memory_space<vmem>>) attributes {dimension_semantics = [#tpu.dimension_semantics<parallel>, #tpu.dimension_semantics<parallel>], iteration_bounds = array<i64: 1, 2>, scalar_prefetch = 0 : i64, scratch_operands = 0 : i64, tpu.core_type = #tpu.core_type<tc>, window_params = [{transform_indices = @transform_0, window_bounds = array<i64: 1, 18, 12>}, {transform_indices = @transform_1, window_bounds = array<i64: 3, 12, 32>}, {transform_indices = @transform_2, window_bounds = array<i64: 1, 32>}, {transform_indices = @transform_3, window_bounds = array<i64: 1, 18, 32>}]} {
    %c0 = arith.constant 0 : index
    %c0_0 = arith.constant 0 : index
    %c0_1 = arith.constant 0 : index
    %0 = vector.load %arg2[%c0, %c0_0, %c0_1] : memref<1x18x12xf32, #tpu.memory_space<vmem>>, vector<1x18x12xf32>
    %1 = vector.shape_cast %0 : vector<1x18x12xf32> to vector<18x12xf32>
    %2 = arith.truncf %1 : vector<18x12xf32> to vector<18x12xbf16>
    %cst = arith.constant 0.000000e+00 : f32
    %3 = vector.broadcast %cst : f32 to vector<16x32xf32>
    %4 = vector.extract_strided_slice %2 {offsets = [0, 0], sizes = [16, 12], strides = [1, 1]} : vector<18x12xbf16> to vector<16x12xbf16>
    %c0_2 = arith.constant 0 : index
    %c0_3 = arith.constant 0 : index
    %c0_4 = arith.constant 0 : index
    %5 = vector.load %arg3[%c0_2, %c0_3, %c0_4] : memref<3x12x32xbf16, #tpu.memory_space<vmem>>, vector<1x12x32xbf16>
    %6 = vector.shape_cast %5 : vector<1x12x32xbf16> to vector<12x32xbf16>
    %cst_5 = arith.constant dense<0.000000e+00> : vector<16x32xf32>
    %7 = tpu.matmul %4, %6, %cst_5 {dimension_numbers = #tpu.dot_dimension_numbers<[1], [0], [0], [1], [0, 0, 1, 1], [], []>} : vector<16x12xbf16>, vector<12x32xbf16>, vector<16x32xf32> -> vector<16x32xf32>
    %8 = arith.addf %3, %7 : vector<16x32xf32>
    %9 = vector.extract_strided_slice %2 {offsets = [1, 0], sizes = [16, 12], strides = [1, 1]} : vector<18x12xbf16> to vector<16x12xbf16>
    %c1 = arith.constant 1 : index
    %c0_6 = arith.constant 0 : index
    %c0_7 = arith.constant 0 : index
    %10 = vector.load %arg3[%c1, %c0_6, %c0_7] : memref<3x12x32xbf16, #tpu.memory_space<vmem>>, vector<1x12x32xbf16>
    %11 = vector.shape_cast %10 : vector<1x12x32xbf16> to vector<12x32xbf16>
    %cst_8 = arith.constant dense<0.000000e+00> : vector<16x32xf32>
    %12 = tpu.matmul %9, %11, %cst_8 {dimension_numbers = #tpu.dot_dimension_numbers<[1], [0], [0], [1], [0, 0, 1, 1], [], []>} : vector<16x12xbf16>, vector<12x32xbf16>, vector<16x32xf32> -> vector<16x32xf32>
    %13 = arith.addf %8, %12 : vector<16x32xf32>
    %14 = vector.extract_strided_slice %2 {offsets = [2, 0], sizes = [16, 12], strides = [1, 1]} : vector<18x12xbf16> to vector<16x12xbf16>
    %c2 = arith.constant 2 : index
    %c0_9 = arith.constant 0 : index
    %c0_10 = arith.constant 0 : index
    %15 = vector.load %arg3[%c2, %c0_9, %c0_10] : memref<3x12x32xbf16, #tpu.memory_space<vmem>>, vector<1x12x32xbf16>
    %16 = vector.shape_cast %15 : vector<1x12x32xbf16> to vector<12x32xbf16>
    %cst_11 = arith.constant dense<0.000000e+00> : vector<16x32xf32>
    %17 = tpu.matmul %14, %16, %cst_11 {dimension_numbers = #tpu.dot_dimension_numbers<[1], [0], [0], [1], [0, 0, 1, 1], [], []>} : vector<16x12xbf16>, vector<12x32xbf16>, vector<16x32xf32> -> vector<16x32xf32>
    %18 = arith.addf %13, %17 : vector<16x32xf32>
    %c0_12 = arith.constant 0 : index
    %c0_13 = arith.constant 0 : index
    %19 = vector.load %arg4[%c0_12, %c0_13] : memref<1x32xf32, #tpu.memory_space<vmem>>, vector<1x32xf32>
    %20 = vector.broadcast %19 : vector<1x32xf32> to vector<16x32xf32>
    %21 = arith.addf %18, %20 : vector<16x32xf32>
    %cst_14 = arith.constant 0.000000e+00 : f32
    %22 = vector.broadcast %cst_14 : f32 to vector<16x32xf32>
    %23 = arith.maximumf %21, %22 : vector<16x32xf32>
    %cst_15 = arith.constant 0.000000e+00 : f32
    %24 = vector.broadcast %cst_15 : f32 to vector<1x32xf32>
    %c0_16 = arith.constant 0 : index
    %c0_17 = arith.constant 0 : index
    %c0_18 = arith.constant 0 : index
    %25 = vector.load %arg5[%c0_16, %c0_17, %c0_18] : memref<1x18x32xf32, #tpu.memory_space<vmem>>, vector<1x1x32xf32>
    %26 = vector.shape_cast %25 : vector<1x1x32xf32> to vector<1x32xf32>
    %27 = vector.shape_cast %24 : vector<1x32xf32> to vector<1x1x32xf32>
    tpu.vector_store %arg5[%c0_16, %c0_17, %c0_18], %27 {strides = array<i32>} : memref<1x18x32xf32, #tpu.memory_space<vmem>>, vector<1x1x32xf32>,
    %c0_19 = arith.constant 0 : index
    %c17 = arith.constant 17 : index
    %c0_20 = arith.constant 0 : index
    %28 = vector.load %arg5[%c0_19, %c17, %c0_20] : memref<1x18x32xf32, #tpu.memory_space<vmem>>, vector<1x1x32xf32>
    %29 = vector.shape_cast %28 : vector<1x1x32xf32> to vector<1x32xf32>
    %30 = vector.shape_cast %24 : vector<1x32xf32> to vector<1x1x32xf32>
    tpu.vector_store %arg5[%c0_19, %c17, %c0_20], %30 {strides = array<i32>} : memref<1x18x32xf32, #tpu.memory_space<vmem>>, vector<1x1x32xf32>,
    %c0_21 = arith.constant 0 : index
    %c1_22 = arith.constant 1 : index
    %c0_23 = arith.constant 0 : index
    %31 = vector.load %arg5[%c0_21, %c1_22, %c0_23] : memref<1x18x32xf32, #tpu.memory_space<vmem>>, vector<1x16x32xf32>
    %32 = vector.shape_cast %31 : vector<1x16x32xf32> to vector<16x32xf32>
    %33 = vector.shape_cast %23 : vector<16x32xf32> to vector<1x16x32xf32>
    tpu.vector_store %arg5[%c0_21, %c1_22, %c0_23], %33 {strides = array<i32>} : memref<1x18x32xf32, #tpu.memory_space<vmem>>, vector<1x16x32xf32>,
    return
  }
  func.func @transform_0(%arg0: i32, %arg1: i32) -> (i32, i32, i32) {
    %c0_i32 = arith.constant 0 : i32
    %c0_i32_0 = arith.constant 0 : i32
    %c0_i32_1 = arith.constant 0 : i32
    return %arg1, %c0_i32, %c0_i32_0 : i32, i32, i32
  }
  func.func @transform_1(%arg0: i32, %arg1: i32) -> (i32, i32, i32) {
    %c0_i32 = arith.constant 0 : i32
    %c0_i32_0 = arith.constant 0 : i32
    %c0_i32_1 = arith.constant 0 : i32
    return %c0_i32, %c0_i32_0, %arg0 : i32, i32, i32
  }
  func.func @transform_2(%arg0: i32, %arg1: i32) -> (i32, i32) {
    %c0_i32 = arith.constant 0 : i32
    %c0_i32_0 = arith.constant 0 : i32
    return %c0_i32, %arg0 : i32, i32
  }
  func.func @transform_3(%arg0: i32, %arg1: i32) -> (i32, i32, i32) {
    %c0_i32 = arith.constant 0 : i32
    %c0_i32_0 = arith.constant 0 : i32
    return %arg1, %c0_i32, %arg0 : i32, i32, i32
  }
}

module attributes {stable_mosaic.version = 11 : i64} {
  func.func @_resblock_kernel(%arg0: i32, %arg1: i32, %arg2: memref<1x10x32xf32, #tpu.memory_space<vmem>>, %arg3: memref<3x32x32xbf16, #tpu.memory_space<vmem>>, %arg4: memref<1x32xf32, #tpu.memory_space<vmem>>, %arg5: memref<32x32xbf16, #tpu.memory_space<vmem>>, %arg6: memref<1x32xf32, #tpu.memory_space<vmem>>, %arg7: memref<1x10x32xf32, #tpu.memory_space<vmem>>) attributes {dimension_semantics = [#tpu.dimension_semantics<parallel>, #tpu.dimension_semantics<arbitrary>], iteration_bounds = array<i64: 2, 1>, scalar_prefetch = 0 : i64, scratch_operands = 0 : i64, tpu.core_type = #tpu.core_type<tc>, window_params = [{transform_indices = @transform_0, window_bounds = array<i64: 1, 10, 32>}, {pipeline_mode = #tpu.pipeline_mode<synchronous>, transform_indices = @transform_1, window_bounds = array<i64: 3, 32, 32>}, {pipeline_mode = #tpu.pipeline_mode<synchronous>, transform_indices = @transform_2, window_bounds = array<i64: 1, 32>}, {pipeline_mode = #tpu.pipeline_mode<synchronous>, transform_indices = @transform_3, window_bounds = array<i64: 32, 32>}, {pipeline_mode = #tpu.pipeline_mode<synchronous>, transform_indices = @transform_4, window_bounds = array<i64: 1, 32>}, {transform_indices = @transform_5, window_bounds = array<i64: 1, 10, 32>}]} {
    %c8_i32 = arith.constant 8 : i32
    %0 = arith.muli %arg1, %c8_i32 : i32
    %1 = tpu.assume_multiple %0, 8 : i32
    %c0 = arith.constant 0 : index
    %2 = arith.index_cast %1 : i32 to index
    %c0_0 = arith.constant 0 : index
    %3 = vector.load %arg2[%c0, %2, %c0_0] : memref<1x10x32xf32, #tpu.memory_space<vmem>>, vector<1x10x32xf32>
    %4 = vector.shape_cast %3 : vector<1x10x32xf32> to vector<10x32xf32>
    %cst = arith.constant 0.000000e+00 : f32
    %5 = vector.broadcast %cst : f32 to vector<10x32xf32>
    %6 = arith.maximumf %4, %5 : vector<10x32xf32>
    %7 = arith.truncf %6 : vector<10x32xf32> to vector<10x32xbf16>
    %cst_1 = arith.constant 0.000000e+00 : f32
    %8 = vector.broadcast %cst_1 : f32 to vector<8x32xf32>
    %9 = vector.extract_strided_slice %7 {offsets = [0, 0], sizes = [8, 32], strides = [1, 1]} : vector<10x32xbf16> to vector<8x32xbf16>
    %c0_2 = arith.constant 0 : index
    %c0_3 = arith.constant 0 : index
    %c0_4 = arith.constant 0 : index
    %10 = vector.load %arg3[%c0_2, %c0_3, %c0_4] : memref<3x32x32xbf16, #tpu.memory_space<vmem>>, vector<1x32x32xbf16>
    %11 = vector.shape_cast %10 : vector<1x32x32xbf16> to vector<32x32xbf16>
    %cst_5 = arith.constant dense<0.000000e+00> : vector<8x32xf32>
    %12 = tpu.matmul %9, %11, %cst_5 {dimension_numbers = #tpu.dot_dimension_numbers<[1], [0], [0], [1], [0, 0, 1, 1], [], []>} : vector<8x32xbf16>, vector<32x32xbf16>, vector<8x32xf32> -> vector<8x32xf32>
    %13 = arith.addf %8, %12 : vector<8x32xf32>
    %14 = vector.extract_strided_slice %7 {offsets = [1, 0], sizes = [8, 32], strides = [1, 1]} : vector<10x32xbf16> to vector<8x32xbf16>
    %c1 = arith.constant 1 : index
    %c0_6 = arith.constant 0 : index
    %c0_7 = arith.constant 0 : index
    %15 = vector.load %arg3[%c1, %c0_6, %c0_7] : memref<3x32x32xbf16, #tpu.memory_space<vmem>>, vector<1x32x32xbf16>
    %16 = vector.shape_cast %15 : vector<1x32x32xbf16> to vector<32x32xbf16>
    %cst_8 = arith.constant dense<0.000000e+00> : vector<8x32xf32>
    %17 = tpu.matmul %14, %16, %cst_8 {dimension_numbers = #tpu.dot_dimension_numbers<[1], [0], [0], [1], [0, 0, 1, 1], [], []>} : vector<8x32xbf16>, vector<32x32xbf16>, vector<8x32xf32> -> vector<8x32xf32>
    %18 = arith.addf %13, %17 : vector<8x32xf32>
    %19 = vector.extract_strided_slice %7 {offsets = [2, 0], sizes = [8, 32], strides = [1, 1]} : vector<10x32xbf16> to vector<8x32xbf16>
    %c2 = arith.constant 2 : index
    %c0_9 = arith.constant 0 : index
    %c0_10 = arith.constant 0 : index
    %20 = vector.load %arg3[%c2, %c0_9, %c0_10] : memref<3x32x32xbf16, #tpu.memory_space<vmem>>, vector<1x32x32xbf16>
    %21 = vector.shape_cast %20 : vector<1x32x32xbf16> to vector<32x32xbf16>
    %cst_11 = arith.constant dense<0.000000e+00> : vector<8x32xf32>
    %22 = tpu.matmul %19, %21, %cst_11 {dimension_numbers = #tpu.dot_dimension_numbers<[1], [0], [0], [1], [0, 0, 1, 1], [], []>} : vector<8x32xbf16>, vector<32x32xbf16>, vector<8x32xf32> -> vector<8x32xf32>
    %23 = arith.addf %18, %22 : vector<8x32xf32>
    %c0_12 = arith.constant 0 : index
    %c0_13 = arith.constant 0 : index
    %24 = vector.load %arg4[%c0_12, %c0_13] : memref<1x32xf32, #tpu.memory_space<vmem>>, vector<1x32xf32>
    %25 = vector.broadcast %24 : vector<1x32xf32> to vector<8x32xf32>
    %26 = arith.addf %23, %25 : vector<8x32xf32>
    %cst_14 = arith.constant 0.000000e+00 : f32
    %27 = vector.broadcast %cst_14 : f32 to vector<8x32xf32>
    %28 = arith.maximumf %26, %27 : vector<8x32xf32>
    %29 = arith.truncf %28 : vector<8x32xf32> to vector<8x32xbf16>
    %c0_15 = arith.constant 0 : index
    %c0_16 = arith.constant 0 : index
    %30 = vector.load %arg5[%c0_15, %c0_16] : memref<32x32xbf16, #tpu.memory_space<vmem>>, vector<32x32xbf16>
    %cst_17 = arith.constant dense<0.000000e+00> : vector<8x32xf32>
    %31 = tpu.matmul %29, %30, %cst_17 {dimension_numbers = #tpu.dot_dimension_numbers<[1], [0], [0], [1], [0, 0, 1, 1], [], []>} : vector<8x32xbf16>, vector<32x32xbf16>, vector<8x32xf32> -> vector<8x32xf32>
    %c0_18 = arith.constant 0 : index
    %c0_19 = arith.constant 0 : index
    %32 = vector.load %arg6[%c0_18, %c0_19] : memref<1x32xf32, #tpu.memory_space<vmem>>, vector<1x32xf32>
    %33 = vector.broadcast %32 : vector<1x32xf32> to vector<8x32xf32>
    %34 = arith.addf %31, %33 : vector<8x32xf32>
    %35 = vector.extract_strided_slice %4 {offsets = [1, 0], sizes = [8, 32], strides = [1, 1]} : vector<10x32xf32> to vector<8x32xf32>
    %36 = arith.addf %35, %34 : vector<8x32xf32>
    %c0_i32 = arith.constant 0 : i32
    %37 = arith.cmpi eq, %arg1, %c0_i32 : i32
    %38 = arith.extui %37 : i1 to i32
    %c0_i32_20 = arith.constant 0 : i32
    %39 = arith.cmpi ne, %38, %c0_i32_20 : i32
    scf.if %39 {
      %cst_23 = arith.constant 0.000000e+00 : f32
      %45 = vector.broadcast %cst_23 : f32 to vector<1x32xf32>
      %c0_24 = arith.constant 0 : index
      %c0_25 = arith.constant 0 : index
      %c0_26 = arith.constant 0 : index
      %46 = vector.load %arg7[%c0_24, %c0_25, %c0_26] : memref<1x10x32xf32, #tpu.memory_space<vmem>>, vector<1x1x32xf32>
      %47 = vector.shape_cast %46 : vector<1x1x32xf32> to vector<1x32xf32>
      %48 = vector.shape_cast %45 : vector<1x32xf32> to vector<1x1x32xf32>
      tpu.vector_store %arg7[%c0_24, %c0_25, %c0_26], %48 {strides = array<i32>} : memref<1x10x32xf32, #tpu.memory_space<vmem>>, vector<1x1x32xf32>,
      %c0_27 = arith.constant 0 : index
      %c9 = arith.constant 9 : index
      %c0_28 = arith.constant 0 : index
      %49 = vector.load %arg7[%c0_27, %c9, %c0_28] : memref<1x10x32xf32, #tpu.memory_space<vmem>>, vector<1x1x32xf32>
      %50 = vector.shape_cast %49 : vector<1x1x32xf32> to vector<1x32xf32>
      %51 = vector.shape_cast %45 : vector<1x32xf32> to vector<1x1x32xf32>
      tpu.vector_store %arg7[%c0_27, %c9, %c0_28], %51 {strides = array<i32>} : memref<1x10x32xf32, #tpu.memory_space<vmem>>, vector<1x1x32xf32>,
    } else {
    }
    %c1_i32 = arith.constant 1 : i32
    %40 = arith.addi %1, %c1_i32 : i32
    %c0_21 = arith.constant 0 : index
    %41 = arith.index_cast %40 : i32 to index
    %c0_22 = arith.constant 0 : index
    %42 = vector.load %arg7[%c0_21, %41, %c0_22] : memref<1x10x32xf32, #tpu.memory_space<vmem>>, vector<1x8x32xf32>
    %43 = vector.shape_cast %42 : vector<1x8x32xf32> to vector<8x32xf32>
    %44 = vector.shape_cast %36 : vector<8x32xf32> to vector<1x8x32xf32>
    tpu.vector_store %arg7[%c0_21, %41, %c0_22], %44 {strides = array<i32>} : memref<1x10x32xf32, #tpu.memory_space<vmem>>, vector<1x8x32xf32>,
    return
  }
  func.func @transform_0(%arg0: i32, %arg1: i32) -> (i32, i32, i32) {
    %c0_i32 = arith.constant 0 : i32
    %c0_i32_0 = arith.constant 0 : i32
    %c0_i32_1 = arith.constant 0 : i32
    return %arg0, %c0_i32, %c0_i32_0 : i32, i32, i32
  }
  func.func @transform_1(%arg0: i32, %arg1: i32) -> (i32, i32, i32) {
    %c0_i32 = arith.constant 0 : i32
    %c0_i32_0 = arith.constant 0 : i32
    %c0_i32_1 = arith.constant 0 : i32
    %c0_i32_2 = arith.constant 0 : i32
    return %c0_i32, %c0_i32_0, %c0_i32_1 : i32, i32, i32
  }
  func.func @transform_2(%arg0: i32, %arg1: i32) -> (i32, i32) {
    %c0_i32 = arith.constant 0 : i32
    %c0_i32_0 = arith.constant 0 : i32
    %c0_i32_1 = arith.constant 0 : i32
    return %c0_i32, %c0_i32_0 : i32, i32
  }
  func.func @transform_3(%arg0: i32, %arg1: i32) -> (i32, i32) {
    %c0_i32 = arith.constant 0 : i32
    %c0_i32_0 = arith.constant 0 : i32
    %c0_i32_1 = arith.constant 0 : i32
    return %c0_i32, %c0_i32_0 : i32, i32
  }
  func.func @transform_4(%arg0: i32, %arg1: i32) -> (i32, i32) {
    %c0_i32 = arith.constant 0 : i32
    %c0_i32_0 = arith.constant 0 : i32
    %c0_i32_1 = arith.constant 0 : i32
    return %c0_i32, %c0_i32_0 : i32, i32
  }
  func.func @transform_5(%arg0: i32, %arg1: i32) -> (i32, i32, i32) {
    %c0_i32 = arith.constant 0 : i32
    %c0_i32_0 = arith.constant 0 : i32
    %c0_i32_1 = arith.constant 0 : i32
    return %arg0, %c0_i32, %c0_i32_0 : i32, i32, i32
  }
}

module attributes {stable_mosaic.version = 11 : i64} {
  func.func @_conv_taps_kernel(%arg0: i32, %arg1: i32, %arg2: memref<1x9x64xf32, #tpu.memory_space<vmem>>, %arg3: memref<2x64x32xbf16, #tpu.memory_space<vmem>>, %arg4: memref<1x32xf32, #tpu.memory_space<vmem>>, %arg5: memref<1x10x32xf32, #tpu.memory_space<vmem>>) attributes {dimension_semantics = [#tpu.dimension_semantics<parallel>, #tpu.dimension_semantics<parallel>], iteration_bounds = array<i64: 1, 2>, scalar_prefetch = 0 : i64, scratch_operands = 0 : i64, tpu.core_type = #tpu.core_type<tc>, window_params = [{transform_indices = @transform_0, window_bounds = array<i64: 1, 9, 64>}, {transform_indices = @transform_1, window_bounds = array<i64: 2, 64, 32>}, {transform_indices = @transform_2, window_bounds = array<i64: 1, 32>}, {transform_indices = @transform_3, window_bounds = array<i64: 1, 10, 32>}]} {
    %c0 = arith.constant 0 : index
    %c0_0 = arith.constant 0 : index
    %c0_1 = arith.constant 0 : index
    %0 = vector.load %arg2[%c0, %c0_0, %c0_1] : memref<1x9x64xf32, #tpu.memory_space<vmem>>, vector<1x9x64xf32>
    %1 = vector.shape_cast %0 : vector<1x9x64xf32> to vector<9x64xf32>
    %2 = arith.truncf %1 : vector<9x64xf32> to vector<9x64xbf16>
    %cst = arith.constant 0.000000e+00 : f32
    %3 = vector.broadcast %cst : f32 to vector<8x32xf32>
    %4 = vector.extract_strided_slice %2 {offsets = [0, 0], sizes = [8, 64], strides = [1, 1]} : vector<9x64xbf16> to vector<8x64xbf16>
    %c0_2 = arith.constant 0 : index
    %c0_3 = arith.constant 0 : index
    %c0_4 = arith.constant 0 : index
    %5 = vector.load %arg3[%c0_2, %c0_3, %c0_4] : memref<2x64x32xbf16, #tpu.memory_space<vmem>>, vector<1x64x32xbf16>
    %6 = vector.shape_cast %5 : vector<1x64x32xbf16> to vector<64x32xbf16>
    %cst_5 = arith.constant dense<0.000000e+00> : vector<8x32xf32>
    %7 = tpu.matmul %4, %6, %cst_5 {dimension_numbers = #tpu.dot_dimension_numbers<[1], [0], [0], [1], [0, 0, 1, 1], [], []>} : vector<8x64xbf16>, vector<64x32xbf16>, vector<8x32xf32> -> vector<8x32xf32>
    %8 = arith.addf %3, %7 : vector<8x32xf32>
    %9 = vector.extract_strided_slice %2 {offsets = [1, 0], sizes = [8, 64], strides = [1, 1]} : vector<9x64xbf16> to vector<8x64xbf16>
    %c1 = arith.constant 1 : index
    %c0_6 = arith.constant 0 : index
    %c0_7 = arith.constant 0 : index
    %10 = vector.load %arg3[%c1, %c0_6, %c0_7] : memref<2x64x32xbf16, #tpu.memory_space<vmem>>, vector<1x64x32xbf16>
    %11 = vector.shape_cast %10 : vector<1x64x32xbf16> to vector<64x32xbf16>
    %cst_8 = arith.constant dense<0.000000e+00> : vector<8x32xf32>
    %12 = tpu.matmul %9, %11, %cst_8 {dimension_numbers = #tpu.dot_dimension_numbers<[1], [0], [0], [1], [0, 0, 1, 1], [], []>} : vector<8x64xbf16>, vector<64x32xbf16>, vector<8x32xf32> -> vector<8x32xf32>
    %13 = arith.addf %8, %12 : vector<8x32xf32>
    %c0_9 = arith.constant 0 : index
    %c0_10 = arith.constant 0 : index
    %14 = vector.load %arg4[%c0_9, %c0_10] : memref<1x32xf32, #tpu.memory_space<vmem>>, vector<1x32xf32>
    %15 = vector.broadcast %14 : vector<1x32xf32> to vector<8x32xf32>
    %16 = arith.addf %13, %15 : vector<8x32xf32>
    %cst_11 = arith.constant 0.000000e+00 : f32
    %17 = vector.broadcast %cst_11 : f32 to vector<1x32xf32>
    %c0_12 = arith.constant 0 : index
    %c0_13 = arith.constant 0 : index
    %c0_14 = arith.constant 0 : index
    %18 = vector.load %arg5[%c0_12, %c0_13, %c0_14] : memref<1x10x32xf32, #tpu.memory_space<vmem>>, vector<1x1x32xf32>
    %19 = vector.shape_cast %18 : vector<1x1x32xf32> to vector<1x32xf32>
    %20 = vector.shape_cast %17 : vector<1x32xf32> to vector<1x1x32xf32>
    tpu.vector_store %arg5[%c0_12, %c0_13, %c0_14], %20 {strides = array<i32>} : memref<1x10x32xf32, #tpu.memory_space<vmem>>, vector<1x1x32xf32>,
    %c0_15 = arith.constant 0 : index
    %c9 = arith.constant 9 : index
    %c0_16 = arith.constant 0 : index
    %21 = vector.load %arg5[%c0_15, %c9, %c0_16] : memref<1x10x32xf32, #tpu.memory_space<vmem>>, vector<1x1x32xf32>
    %22 = vector.shape_cast %21 : vector<1x1x32xf32> to vector<1x32xf32>
    %23 = vector.shape_cast %17 : vector<1x32xf32> to vector<1x1x32xf32>
    tpu.vector_store %arg5[%c0_15, %c9, %c0_16], %23 {strides = array<i32>} : memref<1x10x32xf32, #tpu.memory_space<vmem>>, vector<1x1x32xf32>,
    %c0_17 = arith.constant 0 : index
    %c1_18 = arith.constant 1 : index
    %c0_19 = arith.constant 0 : index
    %24 = vector.load %arg5[%c0_17, %c1_18, %c0_19] : memref<1x10x32xf32, #tpu.memory_space<vmem>>, vector<1x8x32xf32>
    %25 = vector.shape_cast %24 : vector<1x8x32xf32> to vector<8x32xf32>
    %26 = vector.shape_cast %16 : vector<8x32xf32> to vector<1x8x32xf32>
    tpu.vector_store %arg5[%c0_17, %c1_18, %c0_19], %26 {strides = array<i32>} : memref<1x10x32xf32, #tpu.memory_space<vmem>>, vector<1x8x32xf32>,
    return
  }
  func.func @transform_0(%arg0: i32, %arg1: i32) -> (i32, i32, i32) {
    %c0_i32 = arith.constant 0 : i32
    %c0_i32_0 = arith.constant 0 : i32
    %c0_i32_1 = arith.constant 0 : i32
    return %arg1, %c0_i32, %c0_i32_0 : i32, i32, i32
  }
  func.func @transform_1(%arg0: i32, %arg1: i32) -> (i32, i32, i32) {
    %c0_i32 = arith.constant 0 : i32
    %c0_i32_0 = arith.constant 0 : i32
    %c0_i32_1 = arith.constant 0 : i32
    return %c0_i32, %c0_i32_0, %arg0 : i32, i32, i32
  }
  func.func @transform_2(%arg0: i32, %arg1: i32) -> (i32, i32) {
    %c0_i32 = arith.constant 0 : i32
    %c0_i32_0 = arith.constant 0 : i32
    return %c0_i32, %arg0 : i32, i32
  }
  func.func @transform_3(%arg0: i32, %arg1: i32) -> (i32, i32, i32) {
    %c0_i32 = arith.constant 0 : i32
    %c0_i32_0 = arith.constant 0 : i32
    return %arg1, %c0_i32, %arg0 : i32, i32, i32
  }
}

module attributes {stable_mosaic.version = 11 : i64} {
  func.func @_conv_taps_kernel(%arg0: i32, %arg1: i32, %arg2: memref<1x5x64xf32, #tpu.memory_space<vmem>>, %arg3: memref<2x64x32xbf16, #tpu.memory_space<vmem>>, %arg4: memref<1x32xf32, #tpu.memory_space<vmem>>, %arg5: memref<1x6x32xf32, #tpu.memory_space<vmem>>) attributes {dimension_semantics = [#tpu.dimension_semantics<parallel>, #tpu.dimension_semantics<parallel>], iteration_bounds = array<i64: 1, 2>, scalar_prefetch = 0 : i64, scratch_operands = 0 : i64, tpu.core_type = #tpu.core_type<tc>, window_params = [{transform_indices = @transform_0, window_bounds = array<i64: 1, 5, 64>}, {transform_indices = @transform_1, window_bounds = array<i64: 2, 64, 32>}, {transform_indices = @transform_2, window_bounds = array<i64: 1, 32>}, {transform_indices = @transform_3, window_bounds = array<i64: 1, 6, 32>}]} {
    %c0 = arith.constant 0 : index
    %c0_0 = arith.constant 0 : index
    %c0_1 = arith.constant 0 : index
    %0 = vector.load %arg2[%c0, %c0_0, %c0_1] : memref<1x5x64xf32, #tpu.memory_space<vmem>>, vector<1x5x64xf32>
    %1 = vector.shape_cast %0 : vector<1x5x64xf32> to vector<5x64xf32>
    %2 = arith.truncf %1 : vector<5x64xf32> to vector<5x64xbf16>
    %cst = arith.constant 0.000000e+00 : f32
    %3 = vector.broadcast %cst : f32 to vector<4x32xf32>
    %4 = vector.extract_strided_slice %2 {offsets = [0, 0], sizes = [4, 64], strides = [1, 1]} : vector<5x64xbf16> to vector<4x64xbf16>
    %c0_2 = arith.constant 0 : index
    %c0_3 = arith.constant 0 : index
    %c0_4 = arith.constant 0 : index
    %5 = vector.load %arg3[%c0_2, %c0_3, %c0_4] : memref<2x64x32xbf16, #tpu.memory_space<vmem>>, vector<1x64x32xbf16>
    %6 = vector.shape_cast %5 : vector<1x64x32xbf16> to vector<64x32xbf16>
    %cst_5 = arith.constant dense<0.000000e+00> : vector<4x32xf32>
    %7 = tpu.matmul %4, %6, %cst_5 {dimension_numbers = #tpu.dot_dimension_numbers<[1], [0], [0], [1], [0, 0, 1, 1], [], []>} : vector<4x64xbf16>, vector<64x32xbf16>, vector<4x32xf32> -> vector<4x32xf32>
    %8 = arith.addf %3, %7 : vector<4x32xf32>
    %9 = vector.extract_strided_slice %2 {offsets = [1, 0], sizes = [4, 64], strides = [1, 1]} : vector<5x64xbf16> to vector<4x64xbf16>
    %c1 = arith.constant 1 : index
    %c0_6 = arith.constant 0 : index
    %c0_7 = arith.constant 0 : index
    %10 = vector.load %arg3[%c1, %c0_6, %c0_7] : memref<2x64x32xbf16, #tpu.memory_space<vmem>>, vector<1x64x32xbf16>
    %11 = vector.shape_cast %10 : vector<1x64x32xbf16> to vector<64x32xbf16>
    %cst_8 = arith.constant dense<0.000000e+00> : vector<4x32xf32>
    %12 = tpu.matmul %9, %11, %cst_8 {dimension_numbers = #tpu.dot_dimension_numbers<[1], [0], [0], [1], [0, 0, 1, 1], [], []>} : vector<4x64xbf16>, vector<64x32xbf16>, vector<4x32xf32> -> vector<4x32xf32>
    %13 = arith.addf %8, %12 : vector<4x32xf32>
    %c0_9 = arith.constant 0 : index
    %c0_10 = arith.constant 0 : index
    %14 = vector.load %arg4[%c0_9, %c0_10] : memref<1x32xf32, #tpu.memory_space<vmem>>, vector<1x32xf32>
    %15 = vector.broadcast %14 : vector<1x32xf32> to vector<4x32xf32>
    %16 = arith.addf %13, %15 : vector<4x32xf32>
    %cst_11 = arith.constant 0.000000e+00 : f32
    %17 = vector.broadcast %cst_11 : f32 to vector<1x32xf32>
    %c0_12 = arith.constant 0 : index
    %c0_13 = arith.constant 0 : index
    %c0_14 = arith.constant 0 : index
    %18 = vector.load %arg5[%c0_12, %c0_13, %c0_14] : memref<1x6x32xf32, #tpu.memory_space<vmem>>, vector<1x1x32xf32>
    %19 = vector.shape_cast %18 : vector<1x1x32xf32> to vector<1x32xf32>
    %20 = vector.shape_cast %17 : vector<1x32xf32> to vector<1x1x32xf32>
    tpu.vector_store %arg5[%c0_12, %c0_13, %c0_14], %20 {strides = array<i32>} : memref<1x6x32xf32, #tpu.memory_space<vmem>>, vector<1x1x32xf32>,
    %c0_15 = arith.constant 0 : index
    %c5 = arith.constant 5 : index
    %c0_16 = arith.constant 0 : index
    %21 = vector.load %arg5[%c0_15, %c5, %c0_16] : memref<1x6x32xf32, #tpu.memory_space<vmem>>, vector<1x1x32xf32>
    %22 = vector.shape_cast %21 : vector<1x1x32xf32> to vector<1x32xf32>
    %23 = vector.shape_cast %17 : vector<1x32xf32> to vector<1x1x32xf32>
    tpu.vector_store %arg5[%c0_15, %c5, %c0_16], %23 {strides = array<i32>} : memref<1x6x32xf32, #tpu.memory_space<vmem>>, vector<1x1x32xf32>,
    %c0_17 = arith.constant 0 : index
    %c1_18 = arith.constant 1 : index
    %c0_19 = arith.constant 0 : index
    %24 = vector.load %arg5[%c0_17, %c1_18, %c0_19] : memref<1x6x32xf32, #tpu.memory_space<vmem>>, vector<1x4x32xf32>
    %25 = vector.shape_cast %24 : vector<1x4x32xf32> to vector<4x32xf32>
    %26 = vector.shape_cast %16 : vector<4x32xf32> to vector<1x4x32xf32>
    tpu.vector_store %arg5[%c0_17, %c1_18, %c0_19], %26 {strides = array<i32>} : memref<1x6x32xf32, #tpu.memory_space<vmem>>, vector<1x4x32xf32>,
    return
  }
  func.func @transform_0(%arg0: i32, %arg1: i32) -> (i32, i32, i32) {
    %c0_i32 = arith.constant 0 : i32
    %c0_i32_0 = arith.constant 0 : i32
    %c0_i32_1 = arith.constant 0 : i32
    return %arg1, %c0_i32, %c0_i32_0 : i32, i32, i32
  }
  func.func @transform_1(%arg0: i32, %arg1: i32) -> (i32, i32, i32) {
    %c0_i32 = arith.constant 0 : i32
    %c0_i32_0 = arith.constant 0 : i32
    %c0_i32_1 = arith.constant 0 : i32
    return %c0_i32, %c0_i32_0, %arg0 : i32, i32, i32
  }
  func.func @transform_2(%arg0: i32, %arg1: i32) -> (i32, i32) {
    %c0_i32 = arith.constant 0 : i32
    %c0_i32_0 = arith.constant 0 : i32
    return %c0_i32, %arg0 : i32, i32
  }
  func.func @transform_3(%arg0: i32, %arg1: i32) -> (i32, i32, i32) {
    %c0_i32 = arith.constant 0 : i32
    %c0_i32_0 = arith.constant 0 : i32
    return %arg1, %c0_i32, %arg0 : i32, i32, i32
  }
}

module attributes {stable_mosaic.version = 11 : i64} {
  func.func @_resblock_kernel(%arg0: i32, %arg1: i32, %arg2: memref<1x6x32xf32, #tpu.memory_space<vmem>>, %arg3: memref<3x32x32xbf16, #tpu.memory_space<vmem>>, %arg4: memref<1x32xf32, #tpu.memory_space<vmem>>, %arg5: memref<32x32xbf16, #tpu.memory_space<vmem>>, %arg6: memref<1x32xf32, #tpu.memory_space<vmem>>, %arg7: memref<1x4x32xf32, #tpu.memory_space<vmem>>) attributes {dimension_semantics = [#tpu.dimension_semantics<parallel>, #tpu.dimension_semantics<arbitrary>], iteration_bounds = array<i64: 2, 1>, scalar_prefetch = 0 : i64, scratch_operands = 0 : i64, tpu.core_type = #tpu.core_type<tc>, window_params = [{transform_indices = @transform_0, window_bounds = array<i64: 1, 6, 32>}, {pipeline_mode = #tpu.pipeline_mode<synchronous>, transform_indices = @transform_1, window_bounds = array<i64: 3, 32, 32>}, {pipeline_mode = #tpu.pipeline_mode<synchronous>, transform_indices = @transform_2, window_bounds = array<i64: 1, 32>}, {pipeline_mode = #tpu.pipeline_mode<synchronous>, transform_indices = @transform_3, window_bounds = array<i64: 32, 32>}, {pipeline_mode = #tpu.pipeline_mode<synchronous>, transform_indices = @transform_4, window_bounds = array<i64: 1, 32>}, {transform_indices = @transform_5, window_bounds = array<i64: 1, 4, 32>}]} {
    %c4_i32 = arith.constant 4 : i32
    %0 = arith.muli %arg1, %c4_i32 : i32
    %1 = tpu.assume_multiple %0, 4 : i32
    %c0 = arith.constant 0 : index
    %2 = arith.index_cast %1 : i32 to index
    %c0_0 = arith.constant 0 : index
    %3 = vector.load %arg2[%c0, %2, %c0_0] : memref<1x6x32xf32, #tpu.memory_space<vmem>>, vector<1x6x32xf32>
    %4 = vector.shape_cast %3 : vector<1x6x32xf32> to vector<6x32xf32>
    %cst = arith.constant 0.000000e+00 : f32
    %5 = vector.broadcast %cst : f32 to vector<6x32xf32>
    %6 = arith.maximumf %4, %5 : vector<6x32xf32>
    %7 = arith.truncf %6 : vector<6x32xf32> to vector<6x32xbf16>
    %cst_1 = arith.constant 0.000000e+00 : f32
    %8 = vector.broadcast %cst_1 : f32 to vector<4x32xf32>
    %9 = vector.extract_strided_slice %7 {offsets = [0, 0], sizes = [4, 32], strides = [1, 1]} : vector<6x32xbf16> to vector<4x32xbf16>
    %c0_2 = arith.constant 0 : index
    %c0_3 = arith.constant 0 : index
    %c0_4 = arith.constant 0 : index
    %10 = vector.load %arg3[%c0_2, %c0_3, %c0_4] : memref<3x32x32xbf16, #tpu.memory_space<vmem>>, vector<1x32x32xbf16>
    %11 = vector.shape_cast %10 : vector<1x32x32xbf16> to vector<32x32xbf16>
    %cst_5 = arith.constant dense<0.000000e+00> : vector<4x32xf32>
    %12 = tpu.matmul %9, %11, %cst_5 {dimension_numbers = #tpu.dot_dimension_numbers<[1], [0], [0], [1], [0, 0, 1, 1], [], []>} : vector<4x32xbf16>, vector<32x32xbf16>, vector<4x32xf32> -> vector<4x32xf32>
    %13 = arith.addf %8, %12 : vector<4x32xf32>
    %14 = vector.extract_strided_slice %7 {offsets = [1, 0], sizes = [4, 32], strides = [1, 1]} : vector<6x32xbf16> to vector<4x32xbf16>
    %c1 = arith.constant 1 : index
    %c0_6 = arith.constant 0 : index
    %c0_7 = arith.constant 0 : index
    %15 = vector.load %arg3[%c1, %c0_6, %c0_7] : memref<3x32x32xbf16, #tpu.memory_space<vmem>>, vector<1x32x32xbf16>
    %16 = vector.shape_cast %15 : vector<1x32x32xbf16> to vector<32x32xbf16>
    %cst_8 = arith.constant dense<0.000000e+00> : vector<4x32xf32>
    %17 = tpu.matmul %14, %16, %cst_8 {dimension_numbers = #tpu.dot_dimension_numbers<[1], [0], [0], [1], [0, 0, 1, 1], [], []>} : vector<4x32xbf16>, vector<32x32xbf16>, vector<4x32xf32> -> vector<4x32xf32>
    %18 = arith.addf %13, %17 : vector<4x32xf32>
    %19 = vector.extract_strided_slice %7 {offsets = [2, 0], sizes = [4, 32], strides = [1, 1]} : vector<6x32xbf16> to vector<4x32xbf16>
    %c2 = arith.constant 2 : index
    %c0_9 = arith.constant 0 : index
    %c0_10 = arith.constant 0 : index
    %20 = vector.load %arg3[%c2, %c0_9, %c0_10] : memref<3x32x32xbf16, #tpu.memory_space<vmem>>, vector<1x32x32xbf16>
    %21 = vector.shape_cast %20 : vector<1x32x32xbf16> to vector<32x32xbf16>
    %cst_11 = arith.constant dense<0.000000e+00> : vector<4x32xf32>
    %22 = tpu.matmul %19, %21, %cst_11 {dimension_numbers = #tpu.dot_dimension_numbers<[1], [0], [0], [1], [0, 0, 1, 1], [], []>} : vector<4x32xbf16>, vector<32x32xbf16>, vector<4x32xf32> -> vector<4x32xf32>
    %23 = arith.addf %18, %22 : vector<4x32xf32>
    %c0_12 = arith.constant 0 : index
    %c0_13 = arith.constant 0 : index
    %24 = vector.load %arg4[%c0_12, %c0_13] : memref<1x32xf32, #tpu.memory_space<vmem>>, vector<1x32xf32>
    %25 = vector.broadcast %24 : vector<1x32xf32> to vector<4x32xf32>
    %26 = arith.addf %23, %25 : vector<4x32xf32>
    %cst_14 = arith.constant 0.000000e+00 : f32
    %27 = vector.broadcast %cst_14 : f32 to vector<4x32xf32>
    %28 = arith.maximumf %26, %27 : vector<4x32xf32>
    %29 = arith.truncf %28 : vector<4x32xf32> to vector<4x32xbf16>
    %c0_15 = arith.constant 0 : index
    %c0_16 = arith.constant 0 : index
    %30 = vector.load %arg5[%c0_15, %c0_16] : memref<32x32xbf16, #tpu.memory_space<vmem>>, vector<32x32xbf16>
    %cst_17 = arith.constant dense<0.000000e+00> : vector<4x32xf32>
    %31 = tpu.matmul %29, %30, %cst_17 {dimension_numbers = #tpu.dot_dimension_numbers<[1], [0], [0], [1], [0, 0, 1, 1], [], []>} : vector<4x32xbf16>, vector<32x32xbf16>, vector<4x32xf32> -> vector<4x32xf32>
    %c0_18 = arith.constant 0 : index
    %c0_19 = arith.constant 0 : index
    %32 = vector.load %arg6[%c0_18, %c0_19] : memref<1x32xf32, #tpu.memory_space<vmem>>, vector<1x32xf32>
    %33 = vector.broadcast %32 : vector<1x32xf32> to vector<4x32xf32>
    %34 = arith.addf %31, %33 : vector<4x32xf32>
    %35 = vector.extract_strided_slice %4 {offsets = [1, 0], sizes = [4, 32], strides = [1, 1]} : vector<6x32xf32> to vector<4x32xf32>
    %36 = arith.addf %35, %34 : vector<4x32xf32>
    %c0_20 = arith.constant 0 : index
    %37 = arith.index_cast %1 : i32 to index
    %c0_21 = arith.constant 0 : index
    %38 = vector.load %arg7[%c0_20, %37, %c0_21] : memref<1x4x32xf32, #tpu.memory_space<vmem>>, vector<1x4x32xf32>
    %39 = vector.shape_cast %38 : vector<1x4x32xf32> to vector<4x32xf32>
    %40 = vector.shape_cast %36 : vector<4x32xf32> to vector<1x4x32xf32>
    tpu.vector_store %arg7[%c0_20, %37, %c0_21], %40 {strides = array<i32>} : memref<1x4x32xf32, #tpu.memory_space<vmem>>, vector<1x4x32xf32>,
    return
  }
  func.func @transform_0(%arg0: i32, %arg1: i32) -> (i32, i32, i32) {
    %c0_i32 = arith.constant 0 : i32
    %c0_i32_0 = arith.constant 0 : i32
    %c0_i32_1 = arith.constant 0 : i32
    return %arg0, %c0_i32, %c0_i32_0 : i32, i32, i32
  }
  func.func @transform_1(%arg0: i32, %arg1: i32) -> (i32, i32, i32) {
    %c0_i32 = arith.constant 0 : i32
    %c0_i32_0 = arith.constant 0 : i32
    %c0_i32_1 = arith.constant 0 : i32
    %c0_i32_2 = arith.constant 0 : i32
    return %c0_i32, %c0_i32_0, %c0_i32_1 : i32, i32, i32
  }
  func.func @transform_2(%arg0: i32, %arg1: i32) -> (i32, i32) {
    %c0_i32 = arith.constant 0 : i32
    %c0_i32_0 = arith.constant 0 : i32
    %c0_i32_1 = arith.constant 0 : i32
    return %c0_i32, %c0_i32_0 : i32, i32
  }
  func.func @transform_3(%arg0: i32, %arg1: i32) -> (i32, i32) {
    %c0_i32 = arith.constant 0 : i32
    %c0_i32_0 = arith.constant 0 : i32
    %c0_i32_1 = arith.constant 0 : i32
    return %c0_i32, %c0_i32_0 : i32, i32
  }
  func.func @transform_4(%arg0: i32, %arg1: i32) -> (i32, i32) {
    %c0_i32 = arith.constant 0 : i32
    %c0_i32_0 = arith.constant 0 : i32
    %c0_i32_1 = arith.constant 0 : i32
    return %c0_i32, %c0_i32_0 : i32, i32
  }
  func.func @transform_5(%arg0: i32, %arg1: i32) -> (i32, i32, i32) {
    %c0_i32 = arith.constant 0 : i32
    %c0_i32_0 = arith.constant 0 : i32
    %c0_i32_1 = arith.constant 0 : i32
    return %arg0, %c0_i32, %c0_i32_0 : i32, i32, i32
  }
}

</mosaic_0001>

<bundles_post_ra>
// kernel: _lambda_.5
= control target key start
LH: loop header
LB: loop body
LE: loop exit
PB: predicated region body
PF: predicated region fallthrough
CT: control target
= control target key end

     0   :  { %s658_s12 = smov 0   ;;  %s660_s13 = smov 0   ;;  %s715_s0 = inlined_call_operand.vmem [shape: f32[2,18,12], index: 0, kind: input, shape index: {}]   ;;  %s716_s1 = inlined_call_operand.vmem [shape: bf16[3,12,32], index: 1, kind: input, shape index: {}]   ;;  %s717_s2 = inlined_call_operand.vmem [shape: f32[1,32], index: 2, kind: input, shape index: {}]   ;;  %s718_s3 = inlined_call_operand.vmem [shape: f32[2,18,32], index: 3, kind: output, shape index: {}]  }
   0x1   :  { %s662_s14 = smov 0  }
   0x2 LB: > { %s22_s15 = sadd.s32 1, %s630_s13  ;;  %p542_p0 = scmp.ge.s32.totalorder %s634_s14, 1  ;;  %s634_s14 = sphi %s662_s14, %s13_s14   ;;  %s630_s13 = sphi %s660_s13, %s720_s13   ;;  %s626_s12 = sphi %s658_s12, %s719_s12  }
   0x3   : > { %p23_p1 = scmp.ge.s32.totalorder %s22_s15, 2  ;;  %p168_p2 = scmp.lt.s32.totalorder %s634_s14, 3 }
   0x5   : > { %s722_s15 = smov (%p23_p1, %s22_s15), 0  ;;  %p169_p3 = pnand %p542_p0, %p168_p2 }
   0x6   : > { %vm255_vm0 = vcmask (!%p169_p3), 1045504   ;;  %v636_v0 = vmov (!%p169_p3), 0.0   ;;  %v609_v1 = vld [vmem:[%s716_s1 + $0x8] sm:$0x3f] (!%p169_p3)   ;;  %v610_v2 = vld [vmem:[%s716_s1] sm:$0x3f] (!%p169_p3)  }
   0x7   : > { %172 = sbr.rel (%p169_p3) target bundleno = 257 (0x101), region = 32  ;;  %564 = vmatprep.subr.bf16.mxu0 (!%p169_p3), %v636_v0  ;;  %570 = vmatprep.subr.bf16.mxu1 (!%p169_p3), %v636_v0  ;;  %p202_p4 = scmp.lt.s32.totalorder (!%p169_p3), %s626_s12, 1  ;;  %v257_v3 = vsel (!%p169_p3), %vm255_vm0, %v609_v1, 0  ;;  %vm637_vm1 = vmmov (!%p169_p3), 0   ;;  %v308_v4 = vsel (!%p169_p3), %vm255_vm0, %v610_v2, 0  ;;  %vm251_vm2 = vcmask (!%p169_p3), 97280  }
   0x8   : > { %566 = vmatprep.mubr.msk.bf16.mxu0 (!%p169_p3), %vm637_vm1, %v636_v0  ;;  %572 = vmatprep.mubr.msk.bf16.mxu1 (!%p169_p3), %vm637_vm1, %v636_v0  ;;  %v611_v13 = vld [vmem:[%s716_s1 + $0x10] sm:$0x3f] (!%p169_p3)   ;;  %vm233_vm3 = vsmask.f32 (!%p169_p3), 7424  ;;  %vm356_vm4 = vcmask (!%p169_p3), 1046528   ;;  %vm425_vm5 = vcmask (!%p169_p3), 253952  }
   0x9   : > { %565 = vmatpush3.bf16.msra.mxu0 (!%p169_p3), %v257_v3  ;;  %571 = vmatpush3.bf16.msra.mxu1 (!%p169_p3), %v308_v4  ;;  %v369_v17 = vsel (!%p169_p3), %vm255_vm0, %v611_v13, 0  ;;  %v555_v33 = vld [vmem:[%s717_s2] ss:$0 sm:$0xff] (!%p169_p3)  ;;  %vm428_vm6 = vcmask (!%p169_p3), 261120  }
   0xa   : > { %576 = vmatprep.subr.bf16.mxu0 (!%p169_p3), %v636_v0 }
   0xe   : > { %s724_s12 = smov (!%p202_p4, %s626_s12), 1 }
   0xf   : > { %s582_s20 = smul.u32 24, %s724_s12 }
  0x11   : > { %s206_s23 = scalar_lea.vmem %s715_s0, %s582_s20  ;;  %s221_s28 = scalar_lea.vmem %s718_s3, %s582_s20 }
  0x12   : > { %v223_v5 = vld [vmem:[%s206_s23] sm:$0xff]  ;;  %v224_v6 = vld [vmem:[%s206_s23 + $0x8] sm:$0xff]  ;;  %v225_v7 = vld [vmem:[%s206_s23 + $0x10] sm:$0x3]  ;;  %426 = vst.msk [vmem:[%s221_s28] sm:$0x1] %vm425_vm5, %v636_v0 }
  0x13   : > { %v226_v8 = vpack.c.bf16 %v224_v6, %v223_v5  ;;  %v227_v9 = vpack.c.bf16 %v225_v7, %v225_v7  ;;  %427 = vst.msk [vmem:[%s221_s28 + $0x11] sm:$0x1] %vm425_vm5, %v636_v0 }
  0x15   : > { %v235_v10 = vshrl.u32 %v226_v8, 16  ;;  %v237_v11 = vshll.u32 %v226_v8, 16  ;;  %v242_v12 = vshll.u32 %v227_v9, 16  ;;  %573 = vmatmul.mubr.msk.bf16.vlgmr.msra.gmra.mrb[0].mxu1 %vm251_vm2, %v226_v8  ;;  %v357_v19 = vrot.slane %v226_v8, 1 }
  0x16   : > { %v358_v20 = vrot.slane %v227_v9, 1 }
  0x17   : > { %v239_v14 = vrot.slane %v237_v11, 1  ;;  %v244_v15 = vrot.slane %v242_v12, 1 }
  0x18   : > { %v359_v21 = vsel %vm356_vm4, %v357_v19, %v358_v20 }
  0x19   : > { %v240_v16 = vor.u32 %v239_v14, %v235_v10 }
  0x1b   : > { %v245_v18 = vsel %vm233_vm3, %v240_v16, %v244_v15 }
  0x1c   : > { %567 = vmatmul.mubr.msk.bf16.vlgmr.msra.gmra.mrb[0].mxu0 %vm251_vm2, %v245_v18 }
  0x1d   : > { %577 = vmatpush3.bf16.msra.mxu0 %v369_v17  ;;  %578 = vmatprep.mubr.msk.bf16.mxu0 %vm637_vm1, %v636_v0 }
  0x24   : > { %579 = vmatmul.mubr.msk.bf16.vlgmr.msra.gmra.mrb[4].mxu0 %vm251_vm2, %v359_v21 }
  0xe8   : > { %v344_v22 = vpop.f32.mrb[0].mxu1 }
  0xe9   : > { %v574_v23 = vpop.f32.mrb[1].mxu1 }
  0xea   : > { %v347_v24 = vpop.f32.mrb[2].mxu1 }
  0xeb   : > { %v575_v25 = vpop.f32.mrb[3].mxu1 }
  0xef   : > { %v293_v26 = vpop.f32.mrb[0].mxu0 }
  0xf0   : > { %v345_v27 = vadd.f32 %v344_v22, %v293_v26  ;;  %v568_v28 = vpop.f32.mrb[1].mxu0 }
  0xf1   : > { %v296_v29 = vpop.f32.mrb[2].mxu0 }
  0xf2   : > { %v348_v30 = vadd.f32 %v347_v24, %v296_v29  ;;  %v569_v31 = vpop.f32.mrb[3].mxu0 }
  0xf7   : > { %v405_v32 = vpop.f32.mrb[4].mxu0 }
  0xf8   : > { %v412_v34 = vadd.f32 %v405_v32, %v345_v27  ;;  %v580_v35 = vpop.f32.mrb[5].mxu0 }
  0xf9   : > { %v408_v36 = vpop.f32.mrb[6].mxu0 }
  0xfa   : > { %v421_v37 = vadd.f32 %v555_v33, %v412_v34  ;;  %v413_v38 = vadd.f32 %v408_v36, %v348_v30  ;;  %v581_v39 = vpop.f32.mrb[7].mxu0 }
  0xfc   : > { %v423_v40 = vmax.f32 %v421_v37, 0.0  ;;  %v422_v41 = vadd.f32 %v555_v33, %v413_v38 }
  0xfe   : > { %429 = vst.msk [vmem:[%s221_s28 + $0x1] sm:$0xff] %vm428_vm6, %v423_v40  ;;  %v424_v42 = vmax.f32 %v422_v41, 0.0 }
 0x100   : > { %430 = vst.msk [vmem:[%s221_s28 + $0x9] sm:$0xff] %vm428_vm6, %v424_v42 }
 0x101 PF: > { %s13_s14 = sadd.s32 1, %s634_s14   ;;  %s719_s12 = smov %s630_s13 }
 0x102   : > { %p10_p5 = scmp.ge.s32.totalorder %s13_s14, 4   ;;  %s720_s13 = smov %s722_s15 }
 0x104   :  { %12 = sbr.rel (!%p10_p5) target bundleno = 2 (0x2), region = 70 }

// kernel: _lambda_.7
= control target key start
LH: loop header
LB: loop body
LE: loop exit
PB: predicated region body
PF: predicated region fallthrough
CT: control target
= control target key end

     0   :  { %s767_s18 = smov 0   ;;  %s769_s19 = smov 0   ;;  %s859_s0 = inlined_call_operand.vmem [shape: f32[2,10,32], index: 0, kind: input, shape index: {}]   ;;  %s860_s1 = inlined_call_operand.vmem [shape: bf16[3,32,32], index: 1, kind: input, shape index: {}]   ;;  %s861_s2 = inlined_call_operand.vmem [shape: f32[1,32], index: 2, kind: input, shape index: {}, may-alias: {2,4}]   ;;  %s862_s3 = inlined_call_operand.vmem [shape: bf16[32,32], index: 3, kind: input, shape index: {}]   ;;  %s863_s4 = inlined_call_operand.vmem [shape: f32[1,32], index: 4, kind: input, shape index: {}, may-alias: {2,4}]   ;;  %s864_s5 = inlined_call_operand.vmem [shape: f32[2,10,32], index: 5, kind: output, shape index: {}]  }
   0x1   :  { %s771_s20 = smov 0  }
   0x2 LB: > { %s27_s21 = sadd.s32 1, %s729_s19  ;;  %p600_p0 = scmp.ge.s32.totalorder %s733_s20, 1  ;;  %s733_s20 = sphi %s771_s20, %s15_s20   ;;  %s729_s19 = sphi %s769_s19, %s866_s19   ;;  %s725_s18 = sphi %s767_s18, %s865_s18  }
   0x3   : > { %p29_p1 = scmp.ge.s32.totalorder %s27_s21, 2  ;;  %p199_p2 = scmp.lt.s32.totalorder %s733_s20, 3 }
   0x5   : > { %s868_s21 = smov (%p29_p1, %s27_s21), 0  ;;  %p200_p3 = pnand %p600_p0, %p199_p2 }
   0x6   : > { %v703_v0 = vld [vmem:[%s860_s1 + $0x10] sm:$0xff] (!%p200_p3)   ;;  %v735_v1 = vmov (!%p200_p3), 0.0   ;;  %v704_v2 = vld [vmem:[%s860_s1] sm:$0xff] (!%p200_p3)   ;;  %v705_v3 = vld [vmem:[%s860_s1 + $0x18] sm:$0xff] (!%p200_p3)   ;;  %vm736_vm0 = vmmov (!%p200_p3), 0   ;;  %p227_p4 = scmp.lt.s32.totalorder (!%p200_p3), %s725_s18, 1 }
   0x7   : > { %203 = sbr.rel (%p200_p3) target bundleno = 476 (0x1dc), region = 40  ;;  %645 = vmatprep.subr.bf16.mxu0 (!%p200_p3), %v735_v1  ;;  %653 = vmatprep.subr.bf16.mxu1 (!%p200_p3), %v735_v1  ;;  %v706_v4 = vld [vmem:[%s860_s1 + $0x8] sm:$0xff] (!%p200_p3)   ;;  %vm273_vm1 = vcmask (!%p200_p3), 261120   ;;  %v707_v13 = vld [vmem:[%s860_s1 + $0x20] sm:$0xff] (!%p200_p3)   ;;  %vm519_vm2 = vcmask (!%p200_p3), 253952   ;;  %vm524_vm3 = vcmask (!%p200_p3), 261121  }
   0x8   : > { %646 = vmatpush3.bf16.msra.mxu0 (!%p200_p3), %v703_v0  ;;  %649 = vmatprep.mubr.msk.bf16.mxu0 (!%p200_p3), %vm736_vm0, %v735_v1  ;;  %v708_v15 = vld [vmem:[%s860_s1 + $0x28] sm:$0xff] (!%p200_p3)   ;;  %v709_v17 = vld [vmem:[%s862_s3] sm:$0xff] (!%p200_p3)  }
   0x9   : > { %654 = vmatpush3.bf16.msra.mxu1 (!%p200_p3), %v704_v2  ;;  %647 = vmatprep.subr.bf16.mxu0 (!%p200_p3), %v735_v1  ;;  %v710_v18 = vld [vmem:[%s862_s3 + $0x8] sm:$0xff] (!%p200_p3)   ;;  %v622_v29 = vld [vmem:[%s861_s2] ss:$0 sm:$0xff] (!%p200_p3) }
   0xa   : > { %655 = vmatprep.subr.bf16.mxu1 (!%p200_p3), %v735_v1  ;;  %657 = vmatprep.mubr.msk.bf16.mxu1 (!%p200_p3), %vm736_vm0, %v735_v1  ;;  %v623_v37 = vld [vmem:[%s863_s4] ss:$0 sm:$0xff] (!%p200_p3) }
   0xc   : > { %648 = vmatpush3.bf16.msra.mxu0 (!%p200_p3), %v705_v3 }
   0xd   : > { %656 = vmatpush3.bf16.msra.mxu1 (!%p200_p3), %v706_v4  ;;  %661 = vmatprep.subr.bf16.mxu0 (!%p200_p3), %v735_v1 }
   0xe   : > { %s870_s18 = smov (!%p227_p4, %s725_s18), 1  ;;  %669 = vmatprep.subr.bf16.mxu1 %v735_v1 }
   0xf   : > { %s631_s30 = sshll.u32 %s870_s18, 4 }
  0x10   : > { %s231_s8 = scalar_lea.vmem %s859_s0, %s631_s30  ;;  %s236_s25 = scalar_lea.vmem %s864_s5, %s631_s30 }
  0x11   : > { %v240_v5 = vld [vmem:[%s231_s8] sm:$0xff]  ;;  %v241_v6 = vld [vmem:[%s231_s8 + $0x8] sm:$0x3]  ;;  %520 = vst.msk [vmem:[%s236_s25] sm:$0x1] %vm519_vm2, %v735_v1 }
  0x12   : > { %v242_v7 = vmax.f32 %v240_v5, 0.0  ;;  %v243_v8 = vmax.f32 %v241_v6, 0.0  ;;  %521 = vst.msk [vmem:[%s236_s25 + $0x9] sm:$0x1] %vm519_vm2, %v735_v1 }
  0x14   : > { %v244_v9 = vpack.c.bf16 %v243_v8, %v242_v7 }
  0x16   : > { %v255_v10 = vshrl.u32 %v244_v9, 16  ;;  %v257_v11 = vshll.u32 %v244_v9, 16  ;;  %658 = vmatmul.mubr.msk.bf16.vlgmr.msra.gmra.mrb[0].mxu1 %vm273_vm1, %v244_v9  ;;  %v377_v16 = vrot.slane %v244_v9, 1 }
  0x17   : > { %673 = vmatprep.mubr.msk.bf16.mxu1 %vm736_vm0, %v735_v1  ;;  %670 = vmatpush3.bf16.msra.mxu1 %v709_v17 }
  0x18   : > { %v259_v12 = vrot.slane %v257_v11, 1  ;;  %671 = vmatprep.subr.bf16.mxu1 %v735_v1 }
  0x1a   : > { %v260_v14 = vor.u32 %v259_v12, %v255_v10 }
  0x1b   : > { %672 = vmatpush3.bf16.msra.mxu1 %v710_v18 }
  0x1c   : > { %650 = vmatmul.mubr.msk.bf16.vlgmr.msra.gmra.mrb[0].mxu0 %vm273_vm1, %v260_v14 }
  0x1d   : > { %662 = vmatpush3.bf16.msra.mxu0 %v707_v13  ;;  %665 = vmatprep.mubr.msk.bf16.mxu0 %vm736_vm0, %v735_v1 }
  0x1e   : > { %663 = vmatprep.subr.bf16.mxu0 %v735_v1 }
  0x21   : > { %664 = vmatpush3.bf16.msra.mxu0 %v708_v15 }
  0x24   : > { %666 = vmatmul.mubr.msk.bf16.vlgmr.msra.gmra.mrb[4].mxu0 %vm273_vm1, %v377_v16 }
  0xe9   : > { %v365_v19 = vpop.f32.mrb[0].mxu1 }
  0xea   : > { %v659_v20 = vpop.f32.mrb[1].mxu1 }
  0xeb   : > { %v368_v21 = vpop.f32.mrb[2].mxu1 }
  0xec   : > { %v660_v22 = vpop.f32.mrb[3].mxu1 }
  0xef   : > { %v311_v23 = vpop.f32.mrb[0].mxu0 }
  0xf0   : > { %v366_v24 = vadd.f32 %v365_v19, %v311_v23  ;;  %v651_v25 = vpop.f32.mrb[1].mxu0 }
  0xf1   : > { %v314_v26 = vpop.f32.mrb[2].mxu0 }
  0xf2   : > { %v652_v27 = vpop.f32.mrb[3].mxu0 }
  0xf7   : > { %v427_v28 = vpop.f32.mrb[4].mxu0 }
  0xf8   : > { %v433_v30 = vadd.f32 %v427_v28, %v366_v24  ;;  %v667_v31 = vpop.f32.mrb[5].mxu0 }
  0xf9   : > { %v430_v32 = vpop.f32.mrb[6].mxu0 }
  0xfa   : > { %v441_v33 = vadd.f32 %v622_v29, %v433_v30  ;;  %v668_v34 = vpop.f32.mrb[7].mxu0 }
  0xfc   : > { %v442_v35 = vmax.f32 %v441_v33, 0.0 }
  0xfe   : > { %v443_v36 = vpack.c.bf16 %v442_v35, %v442_v35 }
 0x100   : > { %674 = vmatmul.mubr.msk.bf16.vlgmr.msra.gmra.mrb[4].mxu1 %vm273_vm1, %v443_v36 }
 0x1d3   : > { %v504_v38 = vpop.f32.mrb[4].mxu1 }
 0x1d4   : > { %v505_v39 = vadd.f32 %v623_v37, %v504_v38  ;;  %v675_v40 = vpop.f32.mrb[5].mxu1 }
 0x1d5   : > { %v507_v41 = vpop.f32.mrb[6].mxu1 }
 0x1d6   : > { %v511_v42 = vrot.slane %v505_v39, 7  ;;  %v676_v43 = vpop.f32.mrb[7].mxu1 }
 0x1d8   : > { %v513_v44 = vadd.f32 %v511_v42, %v240_v5  ;;  %v514_v45 = vadd.f32 %v511_v42, %v241_v6 }
 0x1da   : > { %627 = vst.msk [vmem:[%s236_s25] sm:$0xfe] %vm524_vm3, %v513_v44 }
 0x1db   : > { %628 = vst.msk [vmem:[%s236_s25 + $0x8] sm:$0x1] %vm519_vm2, %v514_v45 }
 0x1dc PF: > { %s15_s20 = sadd.s32 1, %s733_s20   ;;  %s865_s18 = smov %s729_s19 }
 0x1dd   : > { %p12_p5 = scmp.ge.s32.totalorder %s15_s20, 4   ;;  %s866_s19 = smov %s868_s21 }
 0x1df   :  { %14 = sbr.rel (!%p12_p5) target bundleno = 2 (0x2), region = 78 }

// kernel: _lambda_.6
= control target key start
LH: loop header
LB: loop body
LE: loop exit
PB: predicated region body
PF: predicated region fallthrough
CT: control target
= control target key end

     0   :  { %s650_s12 = smov 0   ;;  %s652_s13 = smov 0   ;;  %s710_s0 = inlined_call_operand.vmem [shape: f32[2,9,64], index: 0, kind: input, shape index: {}]   ;;  %s711_s1 = inlined_call_operand.vmem [shape: bf16[2,64,32], index: 1, kind: input, shape index: {}]   ;;  %s712_s2 = inlined_call_operand.vmem [shape: f32[1,32], index: 2, kind: input, shape index: {}]   ;;  %s713_s3 = inlined_call_operand.vmem [shape: f32[2,10,32], index: 3, kind: output, shape index: {}]  }
   0x1   :  { %s654_s14 = smov 0  }
   0x2 LB: > { %s22_s15 = sadd.s32 1, %s622_s13  ;;  %p508_p0 = scmp.ge.s32.totalorder %s626_s14, 1  ;;  %s626_s14 = sphi %s654_s14, %s13_s14   ;;  %s622_s13 = sphi %s652_s13, %s715_s13   ;;  %s618_s12 = sphi %s650_s12, %s714_s12  }
   0x3   : > { %p23_p1 = scmp.ge.s32.totalorder %s22_s15, 2  ;;  %p168_p2 = scmp.lt.s32.totalorder %s626_s14, 3 }
   0x5   : > { %s717_s15 = smov (%p23_p1, %s22_s15), 0  ;;  %p169_p3 = pnand %p508_p0, %p168_p2 }
   0x6   : > { %v596_v0 = vld [vmem:[%s711_s1 + $0x20] sm:$0xff] (!%p169_p3)   ;;  %v628_v1 = vmov (!%p169_p3), 0.0   ;;  %v598_v3 = vld [vmem:[%s711_s1 + $0x28] sm:$0xff] (!%p169_p3)   ;;  %vm629_vm0 = vmmov (!%p169_p3), 0   ;;  %p202_p4 = scmp.lt.s32.totalorder (!%p169_p3), %s618_s12, 1  ;;  %v600_v5 = vld [vmem:[%s711_s1 + $0x30] sm:$0xff] (!%p169_p3)  }
   0x7   : > { %172 = sbr.rel (%p169_p3) target bundleno = 243 (0xf3), region = 32  ;;  %546 = vmatprep.subr.bf16.mxu0 (!%p169_p3), %v628_v1  ;;  %558 = vmatprep.subr.bf16.mxu1 (!%p169_p3), %v628_v1  ;;  %v597_v2 = vld [vmem:[%s711_s1] sm:$0xff] (!%p169_p3)   ;;  %v599_v4 = vld [vmem:[%s711_s1 + $0x8] sm:$0xff] (!%p169_p3)   ;;  %v601_v6 = vld [vmem:[%s711_s1 + $0x10] sm:$0xff] (!%p169_p3)   ;;  %vm274_vm1 = vcmask (!%p169_p3), 523264   ;;  %vm392_vm2 = vcmask (!%p169_p3), 253952  }
   0x8   : > { %547 = vmatpush3.bf16.msra.mxu0 (!%p169_p3), %v596_v0  ;;  %554 = vmatprep.mubr.msk.bf16.mxu0 (!%p169_p3), %vm629_vm0, %v628_v1  ;;  %v602_v10 = vld [vmem:[%s711_s1 + $0x38] sm:$0xff] (!%p169_p3)   ;;  %v531_v18 = vld [vmem:[%s712_s2] ss:$0 sm:$0xff] (!%p169_p3)  ;;  %vm395_vm3 = vcmask (!%p169_p3), 261120  }
   0x9   : > { %559 = vmatpush3.bf16.msra.mxu1 (!%p169_p3), %v597_v2  ;;  %548 = vmatprep.subr.bf16.mxu0 (!%p169_p3), %v628_v1  ;;  %v603_v11 = vld [vmem:[%s711_s1 + $0x18] sm:$0xff] (!%p169_p3)  }
   0xa   : > { %560 = vmatprep.subr.bf16.mxu1 (!%p169_p3), %v628_v1  ;;  %566 = vmatprep.mubr.msk.bf16.mxu1 (!%p169_p3), %vm629_vm0, %v628_v1 }
   0xc   : > { %549 = vmatpush3.bf16.msra.mxu0 (!%p169_p3), %v598_v3 }
   0xd   : > { %561 = vmatpush3.bf16.msra.mxu1 (!%p169_p3), %v599_v4  ;;  %550 = vmatprep.subr.bf16.mxu0 (!%p169_p3), %v628_v1 }
   0xe   : > { %s719_s12 = smov (!%p202_p4, %s618_s12), 1  ;;  %562 = vmatprep.subr.bf16.mxu1 %v628_v1 }
   0xf   : > { %s534_s26 = sshll.u32 %s719_s12, 4 }
  0x10   : > { %s206_s4 = scalar_lea.vmem %s710_s0, %s534_s26  ;;  %551 = vmatpush3.bf16.msra.mxu0 %v600_v5  ;;  %s221_s11 = scalar_lea.vmem %s713_s3, %s534_s26 }
  0x11   : > { %v223_v7 = vld [vmem:[%s206_s4] sm:$0xff]  ;;  %v224_v8 = vld [vmem:[%s206_s4 + $0x8] sm:$0x1]  ;;  %563 = vmatpush3.bf16.msra.mxu1 %v601_v6  ;;  %552 = vmatprep.subr.bf16.mxu0 %v628_v1  ;;  %393 = vst.msk [vmem:[%s221_s11] sm:$0x1] %vm392_vm2, %v628_v1 }
  0x12   : > { %v225_v9 = vpack.c.bf16 %v224_v8, %v223_v7  ;;  %564 = vmatprep.subr.bf16.mxu1 %v628_v1  ;;  %394 = vst.msk [vmem:[%s221_s11 + $0x9] sm:$0x1] %vm392_vm2, %v628_v1 }
  0x14   : > { %v244_v12 = vshrl.u32 %v225_v9, 16  ;;  %v246_v13 = vshll.u32 %v225_v9, 16  ;;  %553 = vmatpush3.bf16.msra.mxu0 %v602_v10 }
  0x15   : > { %565 = vmatpush3.bf16.msra.mxu1 %v603_v11 }
  0x16   : > { %v248_v14 = vrot.slane %v246_v13, 1 }
  0x18   : > { %v249_v15 = vor.u32 %v248_v14, %v244_v12  ;;  %567 = vmatmul.mubr.msk.bf16.vlgmr.msra.gmra.mrb[0].mxu1 %vm274_vm1, %v225_v9 }
  0x1a   : > { %555 = vmatmul.mubr.msk.bf16.vlgmr.msra.gmra.mrb[0].mxu0 %vm274_vm1, %v249_v15 }
  0xeb   : > { %v378_v17 = vpop.f32.mrb[0].mxu1 }
  0xec   : > { %v568_v21 = vpop.f32.mrb[1].mxu1 }
  0xed   : > { %v312_v16 = vpop.f32.mrb[0].mxu0  ;;  %v381_v23 = vpop.f32.mrb[2].mxu1 }
  0xee   : > { %v556_v19 = vpop.f32.mrb[1].mxu0  ;;  %v379_v20 = vadd.f32 %v378_v17, %v312_v16  ;;  %v569_v26 = vpop.f32.mrb[3].mxu1 }
  0xef   : > { %v315_v22 = vpop.f32.mrb[2].mxu0 }
  0xf0   : > { %v557_v24 = vpop.f32.mrb[3].mxu0  ;;  %v391_v25 = vadd.f32 %v531_v18, %v379_v20 }
  0xf2   : > { %396 = vst.msk [vmem:[%s221_s11 + $0x1] sm:$0xff] %vm395_vm3, %v391_v25 }
  0xf3 PF: > { %s13_s14 = sadd.s32 1, %s626_s14   ;;  %s714_s12 = smov %s622_s13 }
  0xf4   : > { %p10_p5 = scmp.ge.s32.totalorder %s13_s14, 4   ;;  %s715_s13 = smov %s717_s15 }
  0xf6   :  { %12 = sbr.rel (!%p10_p5) target bundleno = 2 (0x2), region = 69 }

// kernel: _lambda_.8
= control target key start
LH: loop header
LB: loop body
LE: loop exit
PB: predicated region body
PF: predicated region fallthrough
CT: control target
= control target key end

     0   :  { %s634_s12 = smov 0   ;;  %s636_s13 = smov 0   ;;  %s694_s0 = inlined_call_operand.vmem [shape: f32[2,5,64], index: 0, kind: input, shape index: {}]   ;;  %s695_s1 = inlined_call_operand.vmem [shape: bf16[2,64,32], index: 1, kind: input, shape index: {}]   ;;  %s696_s2 = inlined_call_operand.vmem [shape: f32[1,32], index: 2, kind: input, shape index: {}]   ;;  %s697_s3 = inlined_call_operand.vmem [shape: f32[2,6,32], index: 3, kind: output, shape index: {}]  }
   0x1   :  { %s638_s14 = smov 0  }
   0x2 LB: > { %s22_s15 = sadd.s32 1, %s606_s13  ;;  %p496_p0 = scmp.ge.s32.totalorder %s610_s14, 1  ;;  %s610_s14 = sphi %s638_s14, %s13_s14   ;;  %s606_s13 = sphi %s636_s13, %s699_s13   ;;  %s602_s12 = sphi %s634_s12, %s698_s12  }
   0x3   : > { %p23_p1 = scmp.ge.s32.totalorder %s22_s15, 2  ;;  %p167_p2 = scmp.lt.s32.totalorder %s610_s14, 3 }
   0x5   : > { %s701_s15 = smov (%p23_p1, %s22_s15), 0  ;;  %p168_p3 = pnand %p496_p0, %p167_p2 }
   0x6   : > { %v580_v0 = vld [vmem:[%s695_s1 + $0x20] sm:$0xff] (!%p168_p3)   ;;  %v612_v1 = vmov (!%p168_p3), 0.0   ;;  %v582_v3 = vld [vmem:[%s695_s1 + $0x28] sm:$0xff] (!%p168_p3)   ;;  %vm613_vm0 = vmmov (!%p168_p3), 0   ;;  %p199_p4 = scmp.lt.s32.totalorder (!%p168_p3), %s602_s12, 1  ;;  %v584_v5 = vld [vmem:[%s695_s1 + $0x30] sm:$0xff] (!%p168_p3)  }
   0x7   : > { %171 = sbr.rel (%p168_p3) target bundleno = 243 (0xf3), region = 32  ;;  %530 = vmatprep.subr.bf16.mxu0 (!%p168_p3), %v612_v1  ;;  %542 = vmatprep.subr.bf16.mxu1 (!%p168_p3), %v612_v1  ;;  %v581_v2 = vld [vmem:[%s695_s1] sm:$0xff] (!%p168_p3)   ;;  %v583_v4 = vld [vmem:[%s695_s1 + $0x8] sm:$0xff] (!%p168_p3)   ;;  %v585_v6 = vld [vmem:[%s695_s1 + $0x10] sm:$0xff] (!%p168_p3)   ;;  %vm268_vm1 = vcmask (!%p168_p3), 523264   ;;  %vm386_vm2 = vcmask (!%p168_p3), 253952  }
   0x8   : > { %531 = vmatpush3.bf16.msra.mxu0 (!%p168_p3), %v580_v0  ;;  %538 = vmatprep.mubr.msk.bf16.mxu0 (!%p168_p3), %vm613_vm0, %v612_v1  ;;  %v586_v9 = vld [vmem:[%s695_s1 + $0x38] sm:$0xff] (!%p168_p3)   ;;  %v517_v17 = vld [vmem:[%s696_s2] ss:$0 sm:$0xff] (!%p168_p3)  ;;  %vm389_vm3 = vcmask (!%p168_p3), 257024  }
   0x9   : > { %543 = vmatpush3.bf16.msra.mxu1 (!%p168_p3), %v581_v2  ;;  %532 = vmatprep.subr.bf16.mxu0 (!%p168_p3), %v612_v1  ;;  %v587_v10 = vld [vmem:[%s695_s1 + $0x18] sm:$0xff] (!%p168_p3)  }
   0xa   : > { %544 = vmatprep.subr.bf16.mxu1 (!%p168_p3), %v612_v1  ;;  %550 = vmatprep.mubr.msk.bf16.mxu1 (!%p168_p3), %vm613_vm0, %v612_v1 }
   0xc   : > { %533 = vmatpush3.bf16.msra.mxu0 (!%p168_p3), %v582_v3 }
   0xd   : > { %545 = vmatpush3.bf16.msra.mxu1 (!%p168_p3), %v583_v4  ;;  %534 = vmatprep.subr.bf16.mxu0 (!%p168_p3), %v612_v1 }
   0xe   : > { %s703_s12 = smov (!%p199_p4, %s602_s12), 1  ;;  %546 = vmatprep.subr.bf16.mxu1 %v612_v1 }
   0xf   : > { %s497_s26 = sshll.u32 %s703_s12, 3 }
  0x10   : > { %s202_s4 = scalar_lea.vmem %s694_s0, %s497_s26  ;;  %535 = vmatpush3.bf16.msra.mxu0 %v584_v5  ;;  %s216_s11 = scalar_lea.vmem %s697_s3, %s497_s26 }
  0x11   : > { %v218_v7 = vld [vmem:[%s202_s4] sm:$0x1f]  ;;  %547 = vmatpush3.bf16.msra.mxu1 %v585_v6  ;;  %536 = vmatprep.subr.bf16.mxu0 %v612_v1  ;;  %387 = vst.msk [vmem:[%s216_s11] sm:$0x1] %vm386_vm2, %v612_v1  ;;  %388 = vst.msk [vmem:[%s216_s11 + $0x5] sm:$0x1] %vm386_vm2, %v612_v1 }
  0x12   : > { %v219_v8 = vpack.c.bf16 %v218_v7, %v218_v7  ;;  %548 = vmatprep.subr.bf16.mxu1 %v612_v1 }
  0x14   : > { %v238_v11 = vshrl.u32 %v219_v8, 16  ;;  %v240_v12 = vshll.u32 %v219_v8, 16  ;;  %537 = vmatpush3.bf16.msra.mxu0 %v586_v9 }
  0x15   : > { %549 = vmatpush3.bf16.msra.mxu1 %v587_v10 }
  0x16   : > { %v242_v13 = vrot.slane %v240_v12, 1 }
  0x18   : > { %v243_v14 = vor.u32 %v242_v13, %v238_v11  ;;  %551 = vmatmul.mubr.msk.bf16.vlgmr.msra.gmra.mrb[0].mxu1 %vm268_vm1, %v219_v8 }
  0x1a   : > { %539 = vmatmul.mubr.msk.bf16.vlgmr.msra.gmra.mrb[0].mxu0 %vm268_vm1, %v243_v14 }
  0xeb   : > { %v372_v16 = vpop.f32.mrb[0].mxu1 }
  0xec   : > { %v552_v20 = vpop.f32.mrb[1].mxu1 }
  0xed   : > { %v306_v15 = vpop.f32.mrb[0].mxu0  ;;  %v375_v22 = vpop.f32.mrb[2].mxu1 }
  0xee   : > { %v540_v18 = vpop.f32.mrb[1].mxu0  ;;  %v373_v19 = vadd.f32 %v372_v16, %v306_v15  ;;  %v553_v25 = vpop.f32.mrb[3].mxu1 }
  0xef   : > { %v309_v21 = vpop.f32.mrb[2].mxu0 }
  0xf0   : > { %v541_v23 = vpop.f32.mrb[3].mxu0  ;;  %v385_v24 = vadd.f32 %v517_v17, %v373_v19 }
  0xf2   : > { %390 = vst.msk [vmem:[%s216_s11 + $0x1] sm:$0xf] %vm389_vm3, %v385_v24 }
  0xf3 PF: > { %s13_s14 = sadd.s32 1, %s610_s14   ;;  %s698_s12 = smov %s606_s13 }
  0xf4   : > { %p10_p5 = scmp.ge.s32.totalorder %s13_s14, 4   ;;  %s699_s13 = smov %s701_s15 }
  0xf6   :  { %12 = sbr.rel (!%p10_p5) target bundleno = 2 (0x2), region = 69 }

// kernel: _lambda_.9
= control target key start
LH: loop header
LB: loop body
LE: loop exit
PB: predicated region body
PF: predicated region fallthrough
CT: control target
= control target key end

     0   :  { %10 = vsyncpa [#allocation3], 0  ;;  %s1000_s0 = inlined_call_operand.vmem [shape: f32[2,6,32], index: 0, kind: input, shape index: {}]   ;;  %s1001_s1 = inlined_call_operand.vmem [shape: bf16[3,32,32], index: 1, kind: input, shape index: {}]   ;;  %s1002_s2 = inlined_call_operand.vmem [shape: f32[1,32], index: 2, kind: input, shape index: {}, may-alias: {2,4}]   ;;  %s1003_s3 = inlined_call_operand.vmem [shape: bf16[32,32], index: 3, kind: input, shape index: {}]   ;;  %s1004_s4 = inlined_call_operand.vmem [shape: f32[1,32], index: 4, kind: input, shape index: {}, may-alias: {2,4}]   ;;  %s1005_s5 = inlined_call_operand.hbm [shape: f32[2,4,32], index: 5, kind: output, shape index: {}]  }
   0x1   :  { %12 = vsyncpa [#allocation3 + $0x1], 0  ;;  %s850_s18 = smov 0   ;;  %s852_s19 = smov 0  }
   0x2   :  { %s854_s20 = smov 0   ;;  %s856_s21 = smov 0  }
   0x3   :  { %s858_s22 = smov 0   ;;  %s860_s23 = smov 0  }
   0x4 LB: > { %s595_s24 = sadd.s32 4294967295, %s815_s23   ;;  %s596_s25 = sadd.s32 4294967294, %s815_s23   ;;  %s815_s23 = sphi %s860_s23, %s18_s23   ;;  %s811_s22 = sphi %s858_s22, %s1012_s22   ;;  %s807_s21 = sphi %s856_s21, %s1011_s21   ;;  %s803_s20 = sphi %s854_s20, %s1010_s20   ;;  %s799_s19 = sphi %s852_s19, %s1009_s19   ;;  %s795_s18 = sphi %s850_s18, %s1008_s18  }
   0x5   : > { %s30_s26 = sadd.s32 1, %s811_s22  ;;  %s147_s27 = sadd.s32 1, %s803_s20 }
   0x6   : > { %p32_p0 = scmp.ge.s32.totalorder %s30_s26, 2  ;;  %p157_p1 = scmp.ne.s32.totalorder %s803_s20, %s799_s19 }
   0x7   : > { %p158_p2 = scmp.eq.s32.totalorder %s595_s24, 1  ;;  %p163_p3 = scmp.ne.s32.totalorder %s799_s19, %s795_s18 }
   0x8   : > { %s1014_s26 = smov (%p32_p0, %s30_s26), 0  ;;  %p164_p5 = scmp.eq.s32.totalorder %s596_s25, 1 }
   0x9   : > { %p890_p4 = por %p158_p2, %p157_p1  ;;  %s144_s29 = ssub.s32 %s811_s22, %s1014_s26 }
   0xa   : > { %p599_p6 = scmp.ge.s32.totalorder %s815_s23, 1  ;;  %p145_p7 = scmp.eq.s32.totalorder %s144_s29, 0 }
   0xb   : > { %p897_p8 = por %p164_p5, %p163_p3  ;;  %p201_p9 = scmp.lt.s32.totalorder %s815_s23, 3 }
   0xc   : > { %s903_s6 = scalar_select %p145_p7, %s803_s20, %s147_s27  }
   0xd   : > { %p202_p10 = pnand %p599_p6, %p201_p9 }
   0xe   : > { %v729_v0 = vld [vmem:[%s1001_s1 + $0x10] sm:$0xff] (!%p202_p10)   ;;  %v817_v1 = vmov (!%p202_p10), 0.0   ;;  %v730_v2 = vld [vmem:[%s1001_s1] sm:$0xff] (!%p202_p10)   ;;  %v731_v3 = vld [vmem:[%s1001_s1 + $0x18] sm:$0xff] (!%p202_p10)   ;;  %vm818_vm0 = vmmov (!%p202_p10), 0   ;;  %p228_p11 = scmp.lt.s32.totalorder (!%p202_p10), %s807_s21, 1 }
   0xf   : > { %205 = sbr.rel (%p202_p10) target bundleno = 497 (0x1f1), region = 40  ;;  %640 = vmatprep.subr.bf16.mxu0 (!%p202_p10), %v817_v1  ;;  %648 = vmatprep.subr.bf16.mxu1 (!%p202_p10), %v817_v1  ;;  %v732_v4 = vld [vmem:[%s1001_s1 + $0x8] sm:$0xff] (!%p202_p10)   ;;  %vm266_vm1 = vcmask (!%p202_p10), 261120   ;;  %v733_v11 = vld [vmem:[%s1001_s1 + $0x20] sm:$0xff] (!%p202_p10)   ;;  %vm508_vm2 = vcmask (!%p202_p10), 258049  }
  0x10   : > { %641 = vmatpush3.bf16.msra.mxu0 (!%p202_p10), %v729_v0  ;;  %644 = vmatprep.mubr.msk.bf16.mxu0 (!%p202_p10), %vm818_vm0, %v817_v1  ;;  %v734_v13 = vld [vmem:[%s1001_s1 + $0x28] sm:$0xff] (!%p202_p10)   ;;  %v735_v15 = vld [vmem:[%s1003_s3] sm:$0xff] (!%p202_p10)  }
  0x11   : > { %649 = vmatpush3.bf16.msra.mxu1 (!%p202_p10), %v730_v2  ;;  %642 = vmatprep.subr.bf16.mxu0 (!%p202_p10), %v817_v1  ;;  %v736_v16 = vld [vmem:[%s1003_s3 + $0x8] sm:$0xff] (!%p202_p10)   ;;  %v619_v27 = vld [vmem:[%s1002_s2] ss:$0 sm:$0xff] (!%p202_p10) }
  0x12   : > { %650 = vmatprep.subr.bf16.mxu1 (!%p202_p10), %v817_v1  ;;  %652 = vmatprep.mubr.msk.bf16.mxu1 (!%p202_p10), %vm818_vm0, %v817_v1  ;;  %v620_v35 = vld [vmem:[%s1004_s4] ss:$0 sm:$0xff] (!%p202_p10) }
  0x14   : > { %643 = vmatpush3.bf16.msra.mxu0 (!%p202_p10), %v731_v3 }
  0x15   : > { %651 = vmatpush3.bf16.msra.mxu1 (!%p202_p10), %v732_v4  ;;  %656 = vmatprep.subr.bf16.mxu0 (!%p202_p10), %v817_v1 }
  0x16   : > { %s229_s15 = scalar_select %p228_p11, %s807_s21, 1  ;;  %664 = vmatprep.subr.bf16.mxu1 %v817_v1 }
  0x18   : > { %s601_s16 = sshll.u32 %s229_s15, 3  ;;  %s225_s15 = sand.u32 1, %s799_s19  }
  0x19   : > { %s231_s25 = scalar_lea.vmem %s1000_s0, %s601_s16  ;;  %s600_s16 = sshll.u32 %s225_s15, 2 }
  0x1a   : > { %v235_v5 = vld [vmem:[%s231_s25] sm:$0x3f]  ;;  %s625_s25 = sshll.u32 %s807_s21, 6  ;;  %s227_s27 = scalar_lea.vmem [#allocation2], %s600_s16 }
  0x1b   : > { %v236_v6 = vmax.f32 %v235_v5, 0.0  ;;  %s524_s29 = sshll.u32 %s227_s27, 4  ;;  %s953_s9 = scalar_lea.hbm %s1005_s5, %s625_s25  ;;  %s955_s29 = int_to_ptr.vmem [resolvable:$true] %s524_s29 }
  0x1c   : > { %s511_s10 = scalar_lea.sflag [#allocation3], %s225_s15  ;;  %s737_s11 = scalar_lea.vmem %s955_s29, 64 }
  0x1d   : > { %v237_v7 = vpack.c.bf16 %v236_v6, %v236_v6  ;;  %p738_p12 = scmp.ne.s32.totalorder %s955_s29, %s737_s11  ;;  %s819_s21 = smov [#allocation2]  }
  0x1e   : > { %s741_s12 = sshll.u32 %s819_s21, 4  ;;  %s742_s12 = int_to_ptr.vmem [resolvable:$false] %s741_s12 }
  0x1f   : > { %v248_v8 = vshrl.u32 %v237_v7, 16  ;;  %v250_v9 = vshll.u32 %v237_v7, 16  ;;  %653 = vmatmul.mubr.msk.bf16.vlgmr.msra.gmra.mrb[0].mxu1 %vm266_vm1, %v237_v7  ;;  %v370_v14 = vrot.slane %v237_v7, 1  ;;  %p739_p13 = pnand %p738_p12, %p890_p4  ;;  %s743_s13 = scalar_lea.vmem %s742_s12, 128 }
  0x20   : > { %668 = vmatprep.mubr.msk.bf16.mxu1 %vm818_vm0, %v817_v1  ;;  %665 = vmatpush3.bf16.msra.mxu1 %v735_v15  ;;  %p744_p1 = scmp.lt.s32.totalorder %s955_s29, %s742_s12  ;;  %p745_p2 = scmp.lt.s32.totalorder %s743_s13, %s737_s11 }
  0x21   : > { %v252_v10 = vrot.slane %v250_v9, 1  ;;  %666 = vmatprep.subr.bf16.mxu1 %v817_v1  ;;  %p740_p0 = pneg %p739_p13 }
  0x22   : > { %p746_p3 = por %p745_p2, %p744_p1 }
  0x23   : > { %v253_v12 = vor.u32 %v252_v10, %v248_v8 }
  0x24   : > { %667 = vmatpush3.bf16.msra.mxu1 %v736_v16  ;;  %p747_p5 = pnand %p746_p3, %p740_p0 }
  0x25   : > { %645 = vmatmul.mubr.msk.bf16.vlgmr.msra.gmra.mrb[0].mxu0 %vm266_vm1, %v253_v12 }
  0x26   : > { %657 = vmatpush3.bf16.msra.mxu0 %v733_v11  ;;  %660 = vmatprep.mubr.msk.bf16.mxu0 %vm818_vm0, %v817_v1 }
  0x27   : > { %658 = vmatprep.subr.bf16.mxu0 %v817_v1 }
  0x2a   : > { %659 = vmatpush3.bf16.msra.mxu0 %v734_v13 }
  0x2d   : > { %661 = vmatmul.mubr.msk.bf16.vlgmr.msra.gmra.mrb[4].mxu0 %vm266_vm1, %v370_v14 }
  0xf2   : > { %v358_v17 = vpop.f32.mrb[0].mxu1 }
  0xf3   : > { %v654_v18 = vpop.f32.mrb[1].mxu1 }
  0xf4   : > { %v361_v19 = vpop.f32.mrb[2].mxu1 }
  0xf5   : > { %v655_v20 = vpop.f32.mrb[3].mxu1 }
  0xf8   : > { %v304_v21 = vpop.f32.mrb[0].mxu0 }
  0xf9   : > { %v359_v22 = vadd.f32 %v358_v17, %v304_v21  ;;  %v646_v23 = vpop.f32.mrb[1].mxu0 }
  0xfa   : > { %v307_v24 = vpop.f32.mrb[2].mxu0 }
  0xfb   : > { %v647_v25 = vpop.f32.mrb[3].mxu0 }
 0x100   : > { %v420_v26 = vpop.f32.mrb[4].mxu0 }
 0x101   : > { %v426_v28 = vadd.f32 %v420_v26, %v359_v22  ;;  %v662_v29 = vpop.f32.mrb[5].mxu0 }
 0x102   : > { %v423_v30 = vpop.f32.mrb[6].mxu0 }
 0x103   : > { %v434_v31 = vadd.f32 %v619_v27, %v426_v28  ;;  %v663_v32 = vpop.f32.mrb[7].mxu0 }
 0x105   : > { %v435_v33 = vmax.f32 %v434_v31, 0.0 }
 0x107   : > { %v436_v34 = vpack.c.bf16 %v435_v33, %v435_v33 }
 0x109   : > { %669 = vmatmul.mubr.msk.bf16.vlgmr.msra.gmra.mrb[4].mxu1 %vm266_vm1, %v436_v34 }
 0x1dc   : > { %v497_v36 = vpop.f32.mrb[4].mxu1 }
 0x1dd   : > { %v498_v37 = vadd.f32 %v620_v35, %v497_v36  ;;  %v670_v38 = vpop.f32.mrb[5].mxu1 }
 0x1de   : > { %v500_v39 = vpop.f32.mrb[6].mxu1 }
 0x1df   : > { %v504_v40 = vrot.slane %v498_v37, 7  ;;  %v671_v41 = vpop.f32.mrb[7].mxu1 }
 0x1e1   : > { %v506_v42 = vadd.f32 %v504_v40, %v235_v5 }
 0x1e3   : > { %509 = vst.msk [vmem:[%s227_s27 - $0x1] sm:$0x1e] %vm508_vm2, %v506_v42 }
 0x1e4   : > { %750 = shalt.err (!%p747_p5)
}
 0x1e5   : > { %s751_s14 = scalar_lea.hbm %s953_s9, 64  ;;  %s755_s17 = scalar_lea.hbm %s1005_s5, 128 }
 0x1e6   : > { %p752_p6 = scmp.ne.s32.totalorder %s953_s9, %s751_s14  ;;  %p756_p10 = scmp.lt.u32.totalorder %s953_s9, %s1005_s5 }
 0x1e7   : > { %p757_p11 = scmp.lt.u32.totalorder %s755_s17, %s751_s14  ;;  %p759_p13 = scmp.lt.u32.totalorder %s751_s14, %s953_s9 }
 0x1e8   : > { %p753_p7 = pnand %p752_p6, %p890_p4 }
 0x1e9   : > { %p758_p12 = por %p757_p11, %p756_p10 }
 0x1ea   : > { %p754_p9 = pneg %p753_p7 }
 0x1eb   : > { %p760_p0 = por %p759_p13, %p758_p12 }
 0x1ed   : > { %p761_p1 = pnand %p760_p0, %p754_p9 }
 0x1ef   : > { %764 = shalt.err (!%p761_p1)
}
 0x1f0   : > { %672 = dma.vmem_to_hbm [thread:$0]  (%p890_p4), %s955_s29, 64, %s953_s9, %s511_s10  }
 0x1f1 PF: > { %p678_p2 = scmp.ge.s32.totalorder %s815_s23, 2  ;;  %s536_s27 = sand.u32 1, %s795_s18  }
 0x1f2   : > { %s537_s7 = scalar_lea.sflag [#allocation3], %s536_s27 }
 0x1f3   : > { %p675_p3 = pnand %p678_p2, %p897_p8 }
 0x1f5   : > { %790 = dma.done.wait (!%p675_p3), %s537_s7, 64  }
 0x1f6   : > { %792 = vsyncadd (!%p675_p3), %s537_s7, 4294967232  ;;  %s18_s23 = sadd.s32 1, %s815_s23   ;;  %s1008_s18 = smov %s799_s19 }
 0x1f7   : > { %p15_p5 = scmp.ge.s32.totalorder %s18_s23, 4   ;;  %s1009_s19 = smov %s803_s20 }
 0x1f8   : > { %s1010_s20 = smov %s903_s6  ;;  %s1011_s21 = smov %s811_s22 }
 0x1f9   : > { %s1012_s22 = smov %s1014_s26  ;;  %17 = sbr.rel (!%p15_p5) target bundleno = 4 (0x4), region = 79 }
 0x200   :  { %542 = vsyncpa [#allocation3], 1 }
 0x201   :  { %544 = vsyncpa [#allocation3 + $0x1], 1 }

</bundles_post_ra>
